<compile_context>
chip_gen: v6e
topology: v6e:2x2x1
jax: 0.10.0
libtpu: 0.0.40
codegen_flags: <defaults>
</compile_context>

<pallas_src>
import functools

import numpy as np
import jax
import jax.numpy as jnp
from jax.experimental import pallas as pl
from jax.experimental.pallas import tpu as pltpu


# --------------------------------------------------------------------------
# Pallas kernel: conv1 -> relu -> conv2 -> relu -> global max pool ->
#                fc1 -> bn1 -> relu -> fc2 -> bn2 -> relu -> fc3
# --------------------------------------------------------------------------
def _histogram_cnn_kernel(x_ref, w1_ref, b1_ref, w2_ref, b2_ref,
                          wfc1_ref, bfc1_ref, s1_ref, t1_ref,
                          wfc2_ref, bfc2_ref, s2_ref, t2_ref,
                          wfc3_ref, bfc3_ref, out_ref, *, TB, L):
    N = TB * L
    f32 = jnp.float32
    bf16 = jnp.bfloat16
    # DEFAULT matmul precision: one bf16 MXU pass with f32 accumulation.
    dot = functools.partial(jnp.dot, preferred_element_type=f32)

    # Shared boundary masks (hoisted: one iota/mod/compare for conv1 + conv2).
    pos = jax.lax.broadcasted_iota(jnp.int32, (1, N), 1) % L
    mask_m1 = (pos != 0).astype(f32)        # zero the wrap-around at l == 0
    mask_p1 = (pos != L - 1).astype(f32)    # zero the wrap-around at l == L-1

    x = x_ref[...]                                                # (1, N) f32

    # ---- conv1: Conv1d(1, 32, k=3, pad=1) + ReLU (VPU broadcast MACs) ------
    x_m1 = pltpu.roll(x, 1, 1) * mask_m1                          # x[l-1]
    x_p1 = pltpu.roll(x, N - 1, 1) * mask_p1                      # x[l+1]
    w1 = w1_ref[...]                                              # (32, 3) f32
    a1 = (w1[:, 0:1] * x_m1 + w1[:, 1:2] * x + w1[:, 2:3] * x_p1
          + b1_ref[...])                                          # (32, N)
    r1 = jnp.maximum(a1, 0.0)                                     # f32

    # ---- conv2: Conv1d(32, 64, k=3, pad=1) + ReLU, single K=96 matmul ------
    # rolls / mask-multiplies stay f32 (efficient on v5e too); cast each piece
    # to bf16 just before the concat so the (96, N) stack and the MXU operand
    # are half-width with no in-dot convert.
    r1_m1 = pltpu.roll(r1, 1, 1) * mask_m1
    r1_p1 = pltpu.roll(r1, N - 1, 1) * mask_p1
    r1_stack = jnp.concatenate(
        [r1_m1.astype(bf16), r1.astype(bf16), r1_p1.astype(bf16)],
        axis=0)                                                   # (96, N) bf16
    a2 = dot(w2_ref[...], r1_stack) + b2_ref[...]                 # (64, N) f32
    r2 = jnp.maximum(a2, 0.0)

    # ---- AdaptiveMaxPool1d(1): per-batch lane reduce (L lanes each) --------
    pooled = jnp.max(r2.reshape(64, TB, L), axis=-1)              # (64, TB)

    # ---- fc1 + bn1 (eval, folded) + ReLU -- lane-dense (TB, 128) -----------
    # Contract pooled's channel axis (dim 0) so the result is batch-major;
    # avoids materializing an explicit transpose. bf16 operands, f32 accum.
    h1 = jax.lax.dot_general(pooled.astype(bf16), wfc1_ref[...],
                             dimension_numbers=(((0,), (0,)), ((), ())),
                             preferred_element_type=f32) + bfc1_ref[...]
    h1 = jnp.maximum(h1 * s1_ref[...] + t1_ref[...], 0.0)         # (TB, 128)
    # dropout: identity in eval mode

    # ---- fc2 + bn2 (eval, folded) + ReLU -----------------------------------
    h2 = dot(h1.astype(bf16), wfc2_ref[...]) + bfc2_ref[...]      # (TB, 256)
    h2 = jnp.maximum(h2 * s2_ref[...] + t2_ref[...], 0.0)
    # dropout: identity in eval mode

    # ---- fc3 ----------------------------------------------------------------
    out_ref[...] = dot(h2.astype(bf16), wfc3_ref[...]) + bfc3_ref[...]


# --------------------------------------------------------------------------
# Per-generation VMEM budget: activation-tile lane cap + scoped VMEM limit.
#   v5e / v6e: 128 MiB physical VMEM  -> big tiles, raise scoped limit.
#   v7x      :  64 MiB physical VMEM  -> smaller cap, limit <= ~48 MiB.
# --------------------------------------------------------------------------
def _vmem_budget():
    try:
        cap = pltpu.get_tpu_info().vmem_capacity_bytes
    except Exception:
        cap = 64 << 20                      # conservative: assume 64 MiB part
    if cap >= (100 << 20):                  # v5e / v6e class
        return 32768, 80 << 20
    return 16384, 48 << 20                  # v7x class


# --------------------------------------------------------------------------
# Batch-tile selection: largest divisor of B that fits the lane budget and
# satisfies TPU block-shape rules (tile == B, or multiple of 8).  Prefer a
# tile giving >= 2 grid steps (pipelining; shards across v7x's 2 TensorCores)
# as long as the tile stays big enough to amortize per-step overhead.
# --------------------------------------------------------------------------
def _pick_batch_tile(B, L, max_lanes, min_split_lanes=4096):
    def valid(tb):
        return B % tb == 0 and tb * L <= max_lanes and (tb == B or tb % 8 == 0)

    candidates = [tb for tb in range(B, 0, -1) if valid(tb)]
    if not candidates:
        return B
    for tb in candidates:                   # descending: largest split first
        if B // tb >= 2 and tb * L >= min_split_lanes:
            return tb
    return candidates[0]                    # largest valid tile


# --------------------------------------------------------------------------
# Wrapper (parameter folding + pallas_call)
# --------------------------------------------------------------------------
def histogram_cnn_forward(histogram, params, *, batch_tile=None):
    B, L = histogram.shape
    # The flattened-lane conv and the (64, TB, L) pooling reshape assume the
    # per-histogram length maps cleanly onto the 128-wide lane axis.
    assert L % 128 == 0, f"histogram length L={L} must be a multiple of 128"
    out_dim = params["fc3_w"].shape[0]
    eps = 1e-5
    f32 = jnp.float32
    bf16 = jnp.bfloat16

    max_lanes, vmem_limit = _vmem_budget()
    TB = batch_tile if batch_tile is not None else _pick_batch_tile(B, L, max_lanes)
    assert B % TB == 0
    grid = (B // TB,)

    x2d = histogram.astype(f32).reshape(1, B * L)

    # fold eval-mode batchnorm into scale/shift lane row-vectors (f32)
    s1 = params["bn1_gamma"] / jnp.sqrt(params["bn1_var"] + eps)
    t1 = params["bn1_beta"] - params["bn1_mean"] * s1
    s2 = params["bn2_gamma"] / jnp.sqrt(params["bn2_var"] + eps)
    t2 = params["bn2_beta"] - params["bn2_mean"] * s2

    # stack conv2 taps along K: column j = k*32 + c multiplies r1 shifted by k
    w2_stacked = jnp.transpose(params["conv2_w"], (0, 2, 1)).reshape(64, 96)

    # MXU-operand weights pre-cast to bf16 (no per-step convert, half the DMA);
    # biases / BN vectors stay f32.
    args = (
        x2d,                                               # (1, B*L) f32
        params["conv1_w"][:, 0, :].astype(f32),            # (32, 3)
        params["conv1_b"].reshape(32, 1).astype(f32),      # (32, 1)
        w2_stacked.astype(bf16),                           # (64, 96) bf16
        params["conv2_b"].reshape(64, 1).astype(f32),      # (64, 1)
        params["fc1_w"].T.astype(bf16),                    # (64, 128) bf16
        params["fc1_b"].reshape(1, 128).astype(f32),
        s1.reshape(1, 128).astype(f32), t1.reshape(1, 128).astype(f32),
        params["fc2_w"].T.astype(bf16),                    # (128, 256) bf16
        params["fc2_b"].reshape(1, 256).astype(f32),
        s2.reshape(1, 256).astype(f32), t2.reshape(1, 256).astype(f32),
        params["fc3_w"].T.astype(bf16),                    # (256, OUT) bf16
        params["fc3_b"].reshape(1, out_dim).astype(f32),
    )

    def const_spec(a):
        nd = a.ndim
        return pl.BlockSpec(a.shape, lambda *_: (0,) * nd)

    in_specs = ([pl.BlockSpec((1, TB * L), lambda i: (0, i))]
                + [const_spec(a) for a in args[1:]])

    out = pl.pallas_call(
        functools.partial(_histogram_cnn_kernel, TB=TB, L=L),
        out_shape=jax.ShapeDtypeStruct((B, out_dim), f32),
        grid=grid,
        in_specs=in_specs,
        out_specs=pl.BlockSpec((TB, out_dim), lambda i: (i, 0)),
        compiler_params=pltpu.CompilerParams(
            dimension_semantics=("parallel",),
            vmem_limit_bytes=vmem_limit),
    )(*args)

    return out                                             # (B, OUT)


# --------------------------------------------------------------------------
# Pure-JAX reference (mirrors the PyTorch forward, eval mode, f32 HIGHEST)
# --------------------------------------------------------------------------
def reference_forward(histogram, params):
    B, L = histogram.shape
    eps = 1e-5
    hp = jax.lax.Precision.HIGHEST

    def conv1d_same(inp, w, b):          # inp (B, Cin, L), w (Cout, Cin, 3)
        pad = jnp.pad(inp, ((0, 0), (0, 0), (1, 1)))
        out = sum(jnp.einsum("oc,bcl->bol", w[:, :, k], pad[:, :, k:k + L],
                             precision=hp) for k in range(3))
        return out + b[None, :, None]

    x = histogram[:, None, :]                                    # (B, 1, L)
    x = jax.nn.relu(conv1d_same(x, params["conv1_w"], params["conv1_b"]))
    x = jax.nn.relu(conv1d_same(x, params["conv2_w"], params["conv2_b"]))
    x = jnp.max(x, axis=2)                                       # (B, 64)

    def bn(x, g, b, m, v):
        return g * (x - m) / jnp.sqrt(v + eps) + b

    x = jax.nn.relu(bn(x @ params["fc1_w"].T + params["fc1_b"],
                       params["bn1_gamma"], params["bn1_beta"],
                       params["bn1_mean"], params["bn1_var"]))
    x = jax.nn.relu(bn(x @ params["fc2_w"].T + params["fc2_b"],
                       params["bn2_gamma"], params["bn2_beta"],
                       params["bn2_mean"], params["bn2_var"]))
    return x @ params["fc3_w"].T + params["fc3_b"]


# --------------------------------------------------------------------------
# Deterministic parameter init (shapes from HistogramCNN.__init__)
# --------------------------------------------------------------------------
def init_params(key, out_dim):
    ks = jax.random.split(key, 20)
    n = lambda k, s, sc: (sc * jax.random.normal(k, s)).astype(jnp.float32)
    return dict(
        conv1_w=n(ks[0], (32, 1, 3), 0.3),
        conv1_b=n(ks[1], (32,), 0.1),
        conv2_w=n(ks[2], (64, 32, 3), 0.1),
        conv2_b=n(ks[3], (64,), 0.1),
        fc1_w=n(ks[4], (128, 64), 0.1),
        fc1_b=n(ks[5], (128,), 0.1),
        fc2_w=n(ks[6], (256, 128), 0.05),
        fc2_b=n(ks[7], (256,), 0.1),
        fc3_w=n(ks[8], (out_dim, 256), 0.05),
        fc3_b=n(ks[9], (out_dim,), 0.1),
        bn1_gamma=(1.0 + 0.1 * jax.random.normal(ks[10], (128,))).astype(jnp.float32),
        bn1_beta=n(ks[11], (128,), 0.1),
        bn1_mean=n(ks[12], (128,), 0.1),
        bn1_var=jnp.abs(1.0 + 0.2 * jax.random.normal(ks[13], (128,))).astype(jnp.float32),
        bn2_gamma=(1.0 + 0.1 * jax.random.normal(ks[14], (256,))).astype(jnp.float32),
        bn2_beta=n(ks[15], (256,), 0.1),
        bn2_mean=n(ks[16], (256,), 0.1),
        bn2_var=jnp.abs(1.0 + 0.2 * jax.random.normal(ks[17], (256,))).astype(jnp.float32),
    )


if __name__ == "__main__":
    B, L, OUT = 4, 128, 16
    key = jax.random.PRNGKey(0)
    k_x, k_p = jax.random.split(key)

    histogram = jax.random.uniform(k_x, (B, L), dtype=jnp.float32)
    params = init_params(k_p, OUT)

    out = jax.block_until_ready(histogram_cnn_forward(histogram, params))
    ref = jax.block_until_ready(reference_forward(histogram, params))

    assert out.shape == (B, OUT), out.shape
    assert np.all(np.isfinite(np.asarray(out)))
    # Tolerance accounts for bf16-operand / f32-accumulate MXU matmuls in the
    # kernel vs. the HIGHEST-precision f32 reference.
    np.testing.assert_allclose(np.asarray(out), np.asarray(ref),
                               rtol=1e-2, atol=1e-2)
    print("KERNEL_OK")
</pallas_src>

<mosaic_0001>
module attributes {stable_mosaic.version = 11 : i64} {
  func.func @_histogram_cnn_kernel(%arg0: i32, %arg1: memref<1x512xf32, #tpu.memory_space<vmem>>, %arg2: memref<32x3xf32, #tpu.memory_space<vmem>>, %arg3: memref<32x1xf32, #tpu.memory_space<vmem>>, %arg4: memref<64x96xbf16, #tpu.memory_space<vmem>>, %arg5: memref<64x1xf32, #tpu.memory_space<vmem>>, %arg6: memref<64x128xbf16, #tpu.memory_space<vmem>>, %arg7: memref<1x128xf32, #tpu.memory_space<vmem>>, %arg8: memref<1x128xf32, #tpu.memory_space<vmem>>, %arg9: memref<1x128xf32, #tpu.memory_space<vmem>>, %arg10: memref<128x256xbf16, #tpu.memory_space<vmem>>, %arg11: memref<1x256xf32, #tpu.memory_space<vmem>>, %arg12: memref<1x256xf32, #tpu.memory_space<vmem>>, %arg13: memref<1x256xf32, #tpu.memory_space<vmem>>, %arg14: memref<256x16xbf16, #tpu.memory_space<vmem>>, %arg15: memref<1x16xf32, #tpu.memory_space<vmem>>, %arg16: memref<4x16xf32, #tpu.memory_space<vmem>>) attributes {dimension_semantics = [#tpu.dimension_semantics<parallel>], iteration_bounds = array<i64: 1>, scalar_prefetch = 0 : i64, scratch_operands = 0 : i64, tpu.core_type = #tpu.core_type<tc>, window_params = [{transform_indices = @transform_0, window_bounds = array<i64: 1, 512>}, {pipeline_mode = #tpu.pipeline_mode<synchronous>, transform_indices = @transform_1, window_bounds = array<i64: 32, 3>}, {pipeline_mode = #tpu.pipeline_mode<synchronous>, transform_indices = @transform_2, window_bounds = array<i64: 32, 1>}, {pipeline_mode = #tpu.pipeline_mode<synchronous>, transform_indices = @transform_3, window_bounds = array<i64: 64, 96>}, {pipeline_mode = #tpu.pipeline_mode<synchronous>, transform_indices = @transform_4, window_bounds = array<i64: 64, 1>}, {pipeline_mode = #tpu.pipeline_mode<synchronous>, transform_indices = @transform_5, window_bounds = array<i64: 64, 128>}, {pipeline_mode = #tpu.pipeline_mode<synchronous>, transform_indices = @transform_6, window_bounds = array<i64: 1, 128>}, {pipeline_mode = #tpu.pipeline_mode<synchronous>, transform_indices = @transform_7, window_bounds = array<i64: 1, 128>}, {pipeline_mode = #tpu.pipeline_mode<synchronous>, transform_indices = @transform_8, window_bounds = array<i64: 1, 128>}, {pipeline_mode = #tpu.pipeline_mode<synchronous>, transform_indices = @transform_9, window_bounds = array<i64: 128, 256>}, {pipeline_mode = #tpu.pipeline_mode<synchronous>, transform_indices = @transform_10, window_bounds = array<i64: 1, 256>}, {pipeline_mode = #tpu.pipeline_mode<synchronous>, transform_indices = @transform_11, window_bounds = array<i64: 1, 256>}, {pipeline_mode = #tpu.pipeline_mode<synchronous>, transform_indices = @transform_12, window_bounds = array<i64: 1, 256>}, {pipeline_mode = #tpu.pipeline_mode<synchronous>, transform_indices = @transform_13, window_bounds = array<i64: 256, 16>}, {pipeline_mode = #tpu.pipeline_mode<synchronous>, transform_indices = @transform_14, window_bounds = array<i64: 1, 16>}, {transform_indices = @transform_15, window_bounds = array<i64: 4, 16>}]} {
    %0 = tpu.iota {dimensions = array<i32: 1>} : vector<1x512xi32>
    %c128_i32 = arith.constant 128 : i32
    %c0_i32 = arith.constant 0 : i32
    %1 = arith.cmpi eq, %c128_i32, %c0_i32 : i32
    %c1_i32 = arith.constant 1 : i32
    %2 = arith.select %1, %c1_i32, %c128_i32 : i32
    %3 = vector.broadcast %2 : i32 to vector<1x512xi32>
    %4 = arith.remsi %0, %3 : vector<1x512xi32>
    %c0_i32_0 = arith.constant 0 : i32
    %5 = vector.broadcast %c0_i32_0 : i32 to vector<1x512xi32>
    %6 = arith.cmpi ne, %4, %5 : vector<1x512xi32>
    %c0_i32_1 = arith.constant 0 : i32
    %7 = vector.broadcast %c0_i32_1 : i32 to vector<1x512xi32>
    %8 = arith.cmpi slt, %4, %7 : vector<1x512xi32>
    %c0_i32_2 = arith.constant 0 : i32
    %9 = arith.cmpi slt, %2, %c0_i32_2 : i32
    %10 = vector.broadcast %9 : i1 to vector<1x512xi1>
    %11 = vector.broadcast %10 : vector<1x512xi1> to vector<1x512xi1>
    %12 = arith.xori %8, %11 : vector<1x512xi1>
    %13 = arith.andi %12, %6 : vector<1x512xi1>
    %14 = vector.broadcast %2 : i32 to vector<1x512xi32>
    %15 = arith.addi %4, %14 : vector<1x512xi32>
    %16 = arith.select %13, %15, %4 : vector<1x512xi1>, vector<1x512xi32>
    %c0_i32_3 = arith.constant 0 : i32
    %17 = vector.broadcast %c0_i32_3 : i32 to vector<1x512xi32>
    %18 = arith.cmpi ne, %16, %17 : vector<1x512xi32>
    %19 = arith.extui %18 : vector<1x512xi1> to vector<1x512xi32>
    %20 = arith.sitofp %19 : vector<1x512xi32> to vector<1x512xf32>
    %c127_i32 = arith.constant 127 : i32
    %21 = vector.broadcast %c127_i32 : i32 to vector<1x512xi32>
    %22 = arith.cmpi ne, %16, %21 : vector<1x512xi32>
    %23 = arith.extui %22 : vector<1x512xi1> to vector<1x512xi32>
    %24 = arith.sitofp %23 : vector<1x512xi32> to vector<1x512xf32>
    %c0 = arith.constant 0 : index
    %c0_4 = arith.constant 0 : index
    %25 = vector.load %arg1[%c0, %c0_4] : memref<1x512xf32, #tpu.memory_space<vmem>>, vector<1x512xf32>
    %c1_i32_5 = arith.constant 1 : i32
    %26 = tpu.dynamic_rotate %25 by %c1_i32_5 dim 1 : vector<1x512xf32>, i32 -> vector<1x512xf32>
    %27 = arith.mulf %26, %20 : vector<1x512xf32>
    %c511_i32 = arith.constant 511 : i32
    %28 = tpu.dynamic_rotate %25 by %c511_i32 dim 1 : vector<1x512xf32>, i32 -> vector<1x512xf32>
    %29 = arith.mulf %28, %24 : vector<1x512xf32>
    %c0_6 = arith.constant 0 : index
    %c0_7 = arith.constant 0 : index
    %30 = vector.load %arg2[%c0_6, %c0_7] : memref<32x3xf32, #tpu.memory_space<vmem>>, vector<32x3xf32>
    %31 = vector.extract_strided_slice %30 {offsets = [0, 0], sizes = [32, 1], strides = [1, 1]} : vector<32x3xf32> to vector<32x1xf32>
    %32 = vector.broadcast %31 : vector<32x1xf32> to vector<32x512xf32>
    %33 = vector.broadcast %27 : vector<1x512xf32> to vector<32x512xf32>
    %34 = arith.mulf %32, %33 : vector<32x512xf32>
    %35 = vector.extract_strided_slice %30 {offsets = [0, 1], sizes = [32, 1], strides = [1, 1]} : vector<32x3xf32> to vector<32x1xf32>
    %36 = vector.broadcast %35 : vector<32x1xf32> to vector<32x512xf32>
    %37 = vector.broadcast %25 : vector<1x512xf32> to vector<32x512xf32>
    %38 = arith.mulf %36, %37 : vector<32x512xf32>
    %39 = arith.addf %34, %38 : vector<32x512xf32>
    %40 = vector.extract_strided_slice %30 {offsets = [0, 2], sizes = [32, 1], strides = [1, 1]} : vector<32x3xf32> to vector<32x1xf32>
    %41 = vector.broadcast %40 : vector<32x1xf32> to vector<32x512xf32>
    %42 = vector.broadcast %29 : vector<1x512xf32> to vector<32x512xf32>
    %43 = arith.mulf %41, %42 : vector<32x512xf32>
    %44 = arith.addf %39, %43 : vector<32x512xf32>
    %c0_8 = arith.constant 0 : index
    %c0_9 = arith.constant 0 : index
    %45 = vector.load %arg3[%c0_8, %c0_9] : memref<32x1xf32, #tpu.memory_space<vmem>>, vector<32x1xf32>
    %46 = vector.broadcast %45 : vector<32x1xf32> to vector<32x512xf32>
    %47 = arith.addf %44, %46 : vector<32x512xf32>
    %cst = arith.constant 0.000000e+00 : f32
    %48 = vector.broadcast %cst : f32 to vector<32x512xf32>
    %49 = arith.maximumf %47, %48 : vector<32x512xf32>
    %c1_i32_10 = arith.constant 1 : i32
    %50 = tpu.dynamic_rotate %49 by %c1_i32_10 dim 1 : vector<32x512xf32>, i32 -> vector<32x512xf32>
    %51 = vector.broadcast %20 : vector<1x512xf32> to vector<32x512xf32>
    %52 = arith.mulf %50, %51 : vector<32x512xf32>
    %c511_i32_11 = arith.constant 511 : i32
    %53 = tpu.dynamic_rotate %49 by %c511_i32_11 dim 1 : vector<32x512xf32>, i32 -> vector<32x512xf32>
    %54 = vector.broadcast %24 : vector<1x512xf32> to vector<32x512xf32>
    %55 = arith.mulf %53, %54 : vector<32x512xf32>
    %56 = arith.truncf %52 : vector<32x512xf32> to vector<32x512xbf16>
    %57 = arith.truncf %49 : vector<32x512xf32> to vector<32x512xbf16>
    %58 = arith.truncf %55 : vector<32x512xf32> to vector<32x512xbf16>
    %59 = tpu.concatenate %56, %57, %58 in 0 : vector<32x512xbf16>, vector<32x512xbf16>, vector<32x512xbf16> -> vector<96x512xbf16>
    %c0_12 = arith.constant 0 : index
    %c0_13 = arith.constant 0 : index
    %60 = vector.load %arg4[%c0_12, %c0_13] : memref<64x96xbf16, #tpu.memory_space<vmem>>, vector<64x96xbf16>
    %cst_14 = arith.constant dense<0.000000e+00> : vector<64x512xf32>
    %61 = tpu.matmul %60, %59, %cst_14 {dimension_numbers = #tpu.dot_dimension_numbers<[1], [0], [0], [1], [0, 0, 1, 1], [], []>} : vector<64x96xbf16>, vector<96x512xbf16>, vector<64x512xf32> -> vector<64x512xf32>
    %c0_15 = arith.constant 0 : index
    %c0_16 = arith.constant 0 : index
    %62 = vector.load %arg5[%c0_15, %c0_16] : memref<64x1xf32, #tpu.memory_space<vmem>>, vector<64x1xf32>
    %63 = vector.broadcast %62 : vector<64x1xf32> to vector<64x512xf32>
    %64 = arith.addf %61, %63 : vector<64x512xf32>
    %cst_17 = arith.constant 0.000000e+00 : f32
    %65 = vector.broadcast %cst_17 : f32 to vector<64x512xf32>
    %66 = arith.maximumf %64, %65 : vector<64x512xf32>
    %67 = vector.shape_cast %66 : vector<64x512xf32> to vector<64x4x128xf32>
    %cst_18 = arith.constant dense<0xFF800000> : vector<64x4xf32>
    %68 = vector.multi_reduction <maximumf>, %67, %cst_18 [2] : vector<64x4x128xf32> to vector<64x4xf32>
    %69 = arith.truncf %68 : vector<64x4xf32> to vector<64x4xbf16>
    %c0_19 = arith.constant 0 : index
    %c0_20 = arith.constant 0 : index
    %70 = vector.load %arg6[%c0_19, %c0_20] : memref<64x128xbf16, #tpu.memory_space<vmem>>, vector<64x128xbf16>
    %cst_21 = arith.constant dense<0.000000e+00> : vector<4x128xf32>
    %71 = tpu.matmul %69, %70, %cst_21 {dimension_numbers = #tpu.dot_dimension_numbers<[0], [0], [1], [1], [0, 1, 1, 1], [], []>} : vector<64x4xbf16>, vector<64x128xbf16>, vector<4x128xf32> -> vector<4x128xf32>
    %c0_22 = arith.constant 0 : index
    %c0_23 = arith.constant 0 : index
    %72 = vector.load %arg7[%c0_22, %c0_23] : memref<1x128xf32, #tpu.memory_space<vmem>>, vector<1x128xf32>
    %73 = vector.broadcast %72 : vector<1x128xf32> to vector<4x128xf32>
    %74 = arith.addf %71, %73 : vector<4x128xf32>
    %c0_24 = arith.constant 0 : index
    %c0_25 = arith.constant 0 : index
    %75 = vector.load %arg8[%c0_24, %c0_25] : memref<1x128xf32, #tpu.memory_space<vmem>>, vector<1x128xf32>
    %76 = vector.broadcast %75 : vector<1x128xf32> to vector<4x128xf32>
    %77 = arith.mulf %74, %76 : vector<4x128xf32>
    %c0_26 = arith.constant 0 : index
    %c0_27 = arith.constant 0 : index
    %78 = vector.load %arg9[%c0_26, %c0_27] : memref<1x128xf32, #tpu.memory_space<vmem>>, vector<1x128xf32>
    %79 = vector.broadcast %78 : vector<1x128xf32> to vector<4x128xf32>
    %80 = arith.addf %77, %79 : vector<4x128xf32>
    %cst_28 = arith.constant 0.000000e+00 : f32
    %81 = vector.broadcast %cst_28 : f32 to vector<4x128xf32>
    %82 = arith.maximumf %80, %81 : vector<4x128xf32>
    %83 = arith.truncf %82 : vector<4x128xf32> to vector<4x128xbf16>
    %c0_29 = arith.constant 0 : index
    %c0_30 = arith.constant 0 : index
    %84 = vector.load %arg10[%c0_29, %c0_30] : memref<128x256xbf16, #tpu.memory_space<vmem>>, vector<128x256xbf16>
    %cst_31 = arith.constant dense<0.000000e+00> : vector<4x256xf32>
    %85 = tpu.matmul %83, %84, %cst_31 {dimension_numbers = #tpu.dot_dimension_numbers<[1], [0], [0], [1], [0, 0, 1, 1], [], []>} : vector<4x128xbf16>, vector<128x256xbf16>, vector<4x256xf32> -> vector<4x256xf32>
    %c0_32 = arith.constant 0 : index
    %c0_33 = arith.constant 0 : index
    %86 = vector.load %arg11[%c0_32, %c0_33] : memref<1x256xf32, #tpu.memory_space<vmem>>, vector<1x256xf32>
    %87 = vector.broadcast %86 : vector<1x256xf32> to vector<4x256xf32>
    %88 = arith.addf %85, %87 : vector<4x256xf32>
    %c0_34 = arith.constant 0 : index
    %c0_35 = arith.constant 0 : index
    %89 = vector.load %arg12[%c0_34, %c0_35] : memref<1x256xf32, #tpu.memory_space<vmem>>, vector<1x256xf32>
    %90 = vector.broadcast %89 : vector<1x256xf32> to vector<4x256xf32>
    %91 = arith.mulf %88, %90 : vector<4x256xf32>
    %c0_36 = arith.constant 0 : index
    %c0_37 = arith.constant 0 : index
    %92 = vector.load %arg13[%c0_36, %c0_37] : memref<1x256xf32, #tpu.memory_space<vmem>>, vector<1x256xf32>
    %93 = vector.broadcast %92 : vector<1x256xf32> to vector<4x256xf32>
    %94 = arith.addf %91, %93 : vector<4x256xf32>
    %cst_38 = arith.constant 0.000000e+00 : f32
    %95 = vector.broadcast %cst_38 : f32 to vector<4x256xf32>
    %96 = arith.maximumf %94, %95 : vector<4x256xf32>
    %97 = arith.truncf %96 : vector<4x256xf32> to vector<4x256xbf16>
    %c0_39 = arith.constant 0 : index
    %c0_40 = arith.constant 0 : index
    %98 = vector.load %arg14[%c0_39, %c0_40] : memref<256x16xbf16, #tpu.memory_space<vmem>>, vector<256x16xbf16>
    %cst_41 = arith.constant dense<0.000000e+00> : vector<4x16xf32>
    %99 = tpu.matmul %97, %98, %cst_41 {dimension_numbers = #tpu.dot_dimension_numbers<[1], [0], [0], [1], [0, 0, 1, 1], [], []>} : vector<4x256xbf16>, vector<256x16xbf16>, vector<4x16xf32> -> vector<4x16xf32>
    %c0_42 = arith.constant 0 : index
    %c0_43 = arith.constant 0 : index
    %100 = vector.load %arg15[%c0_42, %c0_43] : memref<1x16xf32, #tpu.memory_space<vmem>>, vector<1x16xf32>
    %101 = vector.broadcast %100 : vector<1x16xf32> to vector<4x16xf32>
    %102 = arith.addf %99, %101 : vector<4x16xf32>
    %c0_44 = arith.constant 0 : index
    %c0_45 = arith.constant 0 : index
    %103 = vector.load %arg16[%c0_44, %c0_45] : memref<4x16xf32, #tpu.memory_space<vmem>>, vector<4x16xf32>
    tpu.vector_store %arg16[%c0_44, %c0_45], %102 {strides = array<i32>} : memref<4x16xf32, #tpu.memory_space<vmem>>, vector<4x16xf32>,
    return
  }
  func.func @transform_0(%arg0: i32) -> (i32, i32) {
    %c0_i32 = arith.constant 0 : i32
    %c0_i32_0 = arith.constant 0 : i32
    return %c0_i32, %arg0 : i32, i32
  }
  func.func @transform_1(%arg0: i32) -> (i32, i32) {
    %c0_i32 = arith.constant 0 : i32
    %c0_i32_0 = arith.constant 0 : i32
    %c0_i32_1 = arith.constant 0 : i32
    return %c0_i32, %c0_i32_0 : i32, i32
  }
  func.func @transform_2(%arg0: i32) -> (i32, i32) {
    %c0_i32 = arith.constant 0 : i32
    %c0_i32_0 = arith.constant 0 : i32
    %c0_i32_1 = arith.constant 0 : i32
    return %c0_i32, %c0_i32_0 : i32, i32
  }
  func.func @transform_3(%arg0: i32) -> (i32, i32) {
    %c0_i32 = arith.constant 0 : i32
    %c0_i32_0 = arith.constant 0 : i32
    %c0_i32_1 = arith.constant 0 : i32
    return %c0_i32, %c0_i32_0 : i32, i32
  }
  func.func @transform_4(%arg0: i32) -> (i32, i32) {
    %c0_i32 = arith.constant 0 : i32
    %c0_i32_0 = arith.constant 0 : i32
    %c0_i32_1 = arith.constant 0 : i32
    return %c0_i32, %c0_i32_0 : i32, i32
  }
  func.func @transform_5(%arg0: i32) -> (i32, i32) {
    %c0_i32 = arith.constant 0 : i32
    %c0_i32_0 = arith.constant 0 : i32
    %c0_i32_1 = arith.constant 0 : i32
    return %c0_i32, %c0_i32_0 : i32, i32
  }
  func.func @transform_6(%arg0: i32) -> (i32, i32) {
    %c0_i32 = arith.constant 0 : i32
    %c0_i32_0 = arith.constant 0 : i32
    %c0_i32_1 = arith.constant 0 : i32
    return %c0_i32, %c0_i32_0 : i32, i32
  }
  func.func @transform_7(%arg0: i32) -> (i32, i32) {
    %c0_i32 = arith.constant 0 : i32
    %c0_i32_0 = arith.constant 0 : i32
    %c0_i32_1 = arith.constant 0 : i32
    return %c0_i32, %c0_i32_0 : i32, i32
  }
  func.func @transform_8(%arg0: i32) -> (i32, i32) {
    %c0_i32 = arith.constant 0 : i32
    %c0_i32_0 = arith.constant 0 : i32
    %c0_i32_1 = arith.constant 0 : i32
    return %c0_i32, %c0_i32_0 : i32, i32
  }
  func.func @transform_9(%arg0: i32) -> (i32, i32) {
    %c0_i32 = arith.constant 0 : i32
    %c0_i32_0 = arith.constant 0 : i32
    %c0_i32_1 = arith.constant 0 : i32
    return %c0_i32, %c0_i32_0 : i32, i32
  }
  func.func @transform_10(%arg0: i32) -> (i32, i32) {
    %c0_i32 = arith.constant 0 : i32
    %c0_i32_0 = arith.constant 0 : i32
    %c0_i32_1 = arith.constant 0 : i32
    return %c0_i32, %c0_i32_0 : i32, i32
  }
  func.func @transform_11(%arg0: i32) -> (i32, i32) {
    %c0_i32 = arith.constant 0 : i32
    %c0_i32_0 = arith.constant 0 : i32
    %c0_i32_1 = arith.constant 0 : i32
    return %c0_i32, %c0_i32_0 : i32, i32
  }
  func.func @transform_12(%arg0: i32) -> (i32, i32) {
    %c0_i32 = arith.constant 0 : i32
    %c0_i32_0 = arith.constant 0 : i32
    %c0_i32_1 = arith.constant 0 : i32
    return %c0_i32, %c0_i32_0 : i32, i32
  }
  func.func @transform_13(%arg0: i32) -> (i32, i32) {
    %c0_i32 = arith.constant 0 : i32
    %c0_i32_0 = arith.constant 0 : i32
    %c0_i32_1 = arith.constant 0 : i32
    return %c0_i32, %c0_i32_0 : i32, i32
  }
  func.func @transform_14(%arg0: i32) -> (i32, i32) {
    %c0_i32 = arith.constant 0 : i32
    %c0_i32_0 = arith.constant 0 : i32
    %c0_i32_1 = arith.constant 0 : i32
    return %c0_i32, %c0_i32_0 : i32, i32
  }
  func.func @transform_15(%arg0: i32) -> (i32, i32) {
    %c0_i32 = arith.constant 0 : i32
    %c0_i32_0 = arith.constant 0 : i32
    return %arg0, %c0_i32 : i32, i32
  }
}

</mosaic_0001>

<bundles_post_ra>
// kernel: tpu_custom_call.1
= control target key start
LH: loop header
LB: loop body
LE: loop exit
PB: predicated region body
PF: predicated region fallthrough
CT: control target
= control target key end

     0   :  { %v52_v1 = vlaneseq  ;;  %v4196_v2 = vmov 0   ;;  %v2776_v5 = vmov 2   ;;  %v2777_v10 = vmov 1   ;;  %s2779_s24 = smov 127   ;;  %s4180_s0 = inlined_call_operand.vmem [shape: f32[1,512], index: 0, kind: input, shape index: {}]   ;;  %s4181_s1 = inlined_call_operand.vmem [shape: f32[32,3], index: 1, kind: input, shape index: {}]   ;;  %s4182_s2 = inlined_call_operand.vmem [shape: f32[32,1], index: 2, kind: input, shape index: {}]   ;;  %s4183_s3 = inlined_call_operand.vmem [shape: bf16[64,96], index: 3, kind: input, shape index: {}]   ;;  %s4184_s4 = inlined_call_operand.vmem [shape: f32[64,1], index: 4, kind: input, shape index: {}]   ;;  %s4185_s5 = inlined_call_operand.vmem [shape: bf16[64,128], index: 5, kind: input, shape index: {}]   ;;  %s4186_s6 = inlined_call_operand.vmem [shape: f32[1,128], index: 6, kind: input, shape index: {}]   ;;  %s4187_s7 = inlined_call_operand.vmem [shape: f32[1,128], index: 7, kind: input, shape index: {}]   ;;  %s4188_s8 = inlined_call_operand.vmem [shape: f32[1,128], index: 8, kind: input, shape index: {}]   ;;  %s4189_s9 = inlined_call_operand.vmem [shape: bf16[128,256], index: 9, kind: input, shape index: {}]   ;;  %s4190_s10 = inlined_call_operand.vmem [shape: f32[1,256], index: 10, kind: input, shape index: {}]   ;;  %s4191_s11 = inlined_call_operand.vmem [shape: f32[1,256], index: 11, kind: input, shape index: {}]   ;;  %s4192_s12 = inlined_call_operand.vmem [shape: f32[1,256], index: 12, kind: input, shape index: {}]   ;;  %s4193_s13 = inlined_call_operand.vmem [shape: bf16[256,16], index: 13, kind: input, shape index: {}]   ;;  %s4194_s14 = inlined_call_operand.vmem [shape: f32[1,16], index: 14, kind: input, shape index: {}]   ;;  %s4195_s15 = inlined_call_operand.hbm [shape: f32[4,16], index: 15, kind: output, shape index: {}]  }
   0x1   :  { %v187_v0 = vld [vmem:[%s4181_s1 + $0x10] sm:$0xff]  ;;  %2695 = vset.pattern.permute.xlu1 %v4196_v2  ;;  %682 = vmatprep.mubr.bf16.mxu0 %v4196_v2  ;;  %v129_v4 = vld [vmem:[%s4180_s0] sm:$0xf]  ;;  %s2778_s0 = smov 1   ;;  %v188_v16 = vld [vmem:[%s4181_s1 + $0x18] sm:$0xff] }
   0x2   :  { %201 = vperm.xlu1 %2695, %v187_v0   ;;  %v2870_v3 = vshrl.u32 %v52_v1, 7  ;;  %702 = vmatprep.mubr.bf16.mxu1 %v4196_v2  ;;  %v2883_v9 = vand.u32 127, %v52_v1  ;;  %v186_v18 = vld [vmem:[%s4181_s1 + $0x8] sm:$0xff] }
   0x3   :  { %2697 = vset.pattern.permute.xlu0 %v2776_v5 }
   0x4   :  { %v2877_v6 = vsub.s32 0, %v2870_v3  ;;  %v141_v7 = vsub.s32 2, %v2870_v3  ;;  %v2881_v8 = vsub.s32 1, %v2870_v3  ;;  %v145_v14 = vsub.s32 3, %v2870_v3 }
   0x5   :  { %v2898_v15 = vsub.s32 %v2883_v9, %v2870_v3 }
   0x6   :  { %4202 = vst [vmem:[#allocation5_spill] sm:$0xff] %v2881_v8  ;;  %2696 = vset.pattern.permute.xlu1 %v2777_v10  ;;  %v2886_v11 = vrot.slane %v129_v4, %v2877_v6  ;;  %v2888_v12 = vrot.slane %v129_v4, %v141_v7  ;;  %v2893_v13 = vrot.slane %v129_v4, %v2881_v8 }
   0x7   :  { %250 = vperm.xlu1 %2696, %v187_v0   ;;  %v2907_v17 = vrot.slane %v129_v4, %v145_v14 }
   0x8   :  { %151 = vrot.lane.b32.xlu0 %v2886_v11, %s2778_s0 }
   0xb   :  { %155 = vrot.lane.b32.xlu1 %v2888_v12, %s2778_s0 }
   0xc   :  { %153 = vrot.lane.b32.xlu0 %v2893_v13, %s2778_s0 }
   0xf   :  { %254 = vperm.xlu1 %2696, %v188_v16  }
  0x10   :  { %157 = vrot.lane.b32.xlu0 %v2907_v17, %s2778_s0 }
  0x13   :  { %170 = vrot.lane.b32.xlu1 %v2893_v13, %s2779_s24 }
  0x14   :  { %172 = vrot.lane.b32.xlu0 %v2888_v12, %s2779_s24  ;;  %2698 = vset.pattern.permute.xlu1 %v2776_v5 }
  0x17   :  { %174 = vrot.lane.b32.xlu1 %v2907_v17, %s2779_s24 }
  0x18   :  { %298 = vperm.xlu0 %2697, %v187_v0  }
  0x1b   :  { %302 = vperm.xlu1 %2698, %v188_v16  }
  0x1c   :  { %2701 = vset.pattern.permute.xlu0 %v2777_v10 }
  0x1d   :  { %246 = vperm.xlu0 %2701, %v186_v18  }
  0x1e   :  { %20 = vsyncpa [#allocation3], 0  ;;  %v185_v19 = vld [vmem:[%s4181_s1] sm:$0xff]  ;;  %v355_v20 = vld [vmem:[%s4182_s2 + $0x10] sm:$0xff]  ;;  %v54_v27 = vadd.s32 128, %v2883_v9  ;;  %v55_v29 = vadd.s32 256, %v2883_v9 }
  0x1f   :  { %168 = vrot.lane.b32.xlu1 %v2886_v11, %s2779_s24  ;;  %v354_v21 = vld [vmem:[%s4182_s2 + $0x8] sm:$0xff]  ;;  %v356_v22 = vld [vmem:[%s4182_s2 + $0x18] sm:$0xff]  ;;  %v353_v23 = vld [vmem:[%s4182_s2] sm:$0xff]  ;;  %v56_v30 = vadd.s32 384, %v2883_v9  ;;  %vm159_vm1 = vcmp.lt.s32.totalorder %v2883_v9, 1  ;;  %vm105_vm2 = vcmp.ne.s32.totalorder %v2883_v9, 0 }
  0x20   :  { %2699 = vset.pattern.permute.xlu1 %v4196_v2  ;;  %v68_v32 = vand.u32 127, %v54_v27  ;;  %v75_v33 = vand.u32 127, %v55_v29  ;;  %v4198_v37 = vmov 0.0   ;;  %vm176_vm6 = vcmp.lt.s32.totalorder %v2883_v9, 127 }
  0x21   :  { %2702 = vset.pattern.permute.xlu0 %v4196_v2  ;;  %v82_v34 = vand.u32 127, %v56_v30  ;;  %v2956_v42 = vsel %vm105_vm2, 1.0, %v4198_v37  ;;  %vm117_vm8 = vcmp.ne.s32.totalorder %v2883_v9, 127  ;;  %vm637_vm10 = vcmask 785408  }
  0x22   :  { %206 = vperm.xlu0 %2702, %v188_v16   ;;  %vm106_vm0 = vcmp.ne.s32.totalorder %v68_v32, 0  ;;  %vm107_vm3 = vcmp.ne.s32.totalorder %v75_v33, 0  ;;  %vm118_vm5 = vcmp.ne.s32.totalorder %v68_v32, 127  ;;  %vm119_vm7 = vcmp.ne.s32.totalorder %v75_v33, 127 }
  0x23   :  { %196 = vperm.xlu1 %2699, %v186_v18   ;;  %vm108_vm4 = vcmp.ne.s32.totalorder %v82_v34, 0  ;;  %v2950_v38 = vsel %vm106_vm0, 1.0, %v4198_v37  ;;  %v2959_v43 = vsel %vm107_vm3, 1.0, %v4198_v37  ;;  %v2969_v47 = vsel %vm118_vm5, 1.0, %v4198_v37 }
  0x24   :  { %v2964_v45 = vsel %vm108_vm4, 1.0, %v4198_v37  ;;  %v2981_v56 = vsel %vm119_vm7, 1.0, %v4198_v37  ;;  %vm120_vm9 = vcmp.ne.s32.totalorder %v82_v34, 127  ;;  %v3007_v7 = vsel %vm117_vm8, 1.0, %v4198_v37 }
  0x25   :  { %v3012_v16 = vsel %vm120_vm9, 1.0, %v4198_v37  ;;  %vm1372_vm11 = vcmask 1043456   ;;  %vm2783_vm12 = vmmov 0   ;;  %vm2028_vm13 = vcmask 1041409  }
  0x26   :  { %191 = vperm.xlu0 %2702, %v185_v19   ;;  %vm2030_vm14 = vcmask 1042434   ;;  %vm2032_vm15 = vcmask 1043459   ;;  %vm2034_vm0 = vcmask 1044484   ;;  %vm2038_vm2 = vcmask 1046534  }
  0x27   :  { %2700 = vset.pattern.permute.xlu1 %v2777_v10  ;;  %vm2040_vm3 = vcmask 1047559   ;;  %vm2139_vm4 = vcmask 523264   ;;  %vm2557_vm5 = vcmask 125952  }
  0x28   :  { %242 = vperm.xlu1 %2700, %v185_v19  }
  0x2a   :  { %369 = vperm.xlu0 %2702, %v355_v20  }
  0x2c   :  { %2703 = vset.pattern.permute.xlu1 %v2776_v5 }
  0x2d   :  { %290 = vperm.xlu1 %2703, %v185_v19  }
  0x2e   :  { %364 = vperm.xlu0 %2702, %v354_v21  }
  0x31   :  { %294 = vperm.xlu1 %2703, %v186_v18  }
  0x35   :  { %2704 = vset.pattern.permute.xlu1 %v4196_v2 }
  0x36   :  { %374 = vperm.xlu1 %2704, %v356_v22  }
  0x3a   :  { %359 = vperm.xlu1 %2704, %v353_v23  }
  0x7a   :  { %v152_v25 = vpop.permute.xlu0 %151 }
  0x7d   :  { %v2940_v24 = vpop.permute.xlu1 %201 }
  0x7e   :  { %v154_v28 = vpop.permute.xlu0 %153 }
  0x7f   :  { %v162_v39 = vsel %vm159_vm1, %v152_v25, %v154_v28 }
  0x80   :  { %v165_v48 = vmul.f32 %v2950_v38, %v162_v39 }
  0x82   :  { %v2942_v26 = vpop.permute.xlu1 %250  ;;  %v158_v35 = vpop.permute.xlu0 %157  ;;  %v2988_v59 = vrot.slane %v165_v48, %v2877_v6 }
  0x83   :  { %v163_v44 = vsel %vm159_vm1, %v158_v35, %v152_v25  ;;  %v266_v5 = vmul.f32 %v2942_v26, %v2893_v13  ;;  %v267_v29 = vmul.f32 %v2942_v26, %v2888_v12  ;;  %v268_v30 = vmul.f32 %v2942_v26, %v2907_v17 }
  0x84   :  { %v164_v52 = vmul.f32 %v2956_v42, %v163_v44  ;;  %v234_v10 = vmul.f32 %v2988_v59, %v2940_v24 }
  0x86   :  { %v156_v31 = vpop.permute.xlu1 %155  ;;  %v173_v41 = vpop.permute.xlu0 %172  ;;  %v212_v61 = vrot.slane %v164_v52, %v2877_v6  ;;  %v282_v32 = vadd.f32 %v266_v5, %v234_v10 }
  0x87   :  { %v161_v46 = vsel %vm159_vm1, %v154_v28, %v156_v31  ;;  %v160_v49 = vsel %vm159_vm1, %v156_v31, %v158_v35  ;;  %v265_v28 = vmul.f32 %v2942_v26, %v2886_v11 }
  0x88   :  { %v166_v53 = vmul.f32 %v2959_v43, %v161_v46  ;;  %v167_v54 = vmul.f32 %v2964_v45, %v160_v49  ;;  %v233_v21 = vmul.f32 %v212_v61, %v2940_v24 }
  0x8a   :  { %v255_v36 = vpop.permute.xlu1 %254  ;;  %v2995_v62 = vrot.slane %v166_v53, %v2877_v6  ;;  %v2999_v0 = vrot.slane %v167_v54, %v2877_v6  ;;  %v281_v46 = vadd.f32 %v265_v28, %v233_v21 }
  0x8b   :  { %v269_v33 = vmul.f32 %v255_v36, %v2886_v11  ;;  %v270_v34 = vmul.f32 %v255_v36, %v2893_v13  ;;  %v271_v35 = vmul.f32 %v255_v36, %v2888_v12  ;;  %v272_v39 = vmul.f32 %v255_v36, %v2907_v17 }
  0x8c   :  { %v235_v20 = vmul.f32 %v2995_v62, %v2940_v24  ;;  %v236_v27 = vmul.f32 %v2999_v0, %v2940_v24 }
  0x8e   :  { %v171_v40 = vpop.permute.xlu1 %170 }
  0x8f   :  { %v178_v50 = vsel %vm176_vm6, %v171_v40, %v173_v41 }
  0x90   :  { %v182_v55 = vmul.f32 %v2969_v47, %v178_v50  ;;  %v284_v50 = vadd.f32 %v268_v30, %v236_v27 }
  0x92   :  { %v175_v51 = vpop.permute.xlu1 %174  ;;  %v3002_v1 = vrot.slane %v182_v55, %v2877_v6 }
  0x93   :  { %v177_v57 = vsel %vm176_vm6, %v173_v41, %v175_v51  ;;  %v2985_v58 = vpop.permute.xlu0 %298  ;;  %v283_v41 = vadd.f32 %v267_v29, %v235_v20 }
  0x94   :  { %v183_v63 = vmul.f32 %v2981_v56, %v177_v57  ;;  %v330_v25 = vmul.f32 %v3002_v1, %v2985_v58 }
  0x96   :  { %v2990_v60 = vpop.permute.xlu1 %302  ;;  %v3015_v18 = vrot.slane %v183_v63, %v2877_v6  ;;  %v346_v48 = vadd.f32 %v330_v25, %v282_v32 }
  0x97   :  { %v334_v49 = vmul.f32 %v3002_v1, %v2990_v60 }
  0x98   :  { %v247_v4 = vpop.permute.xlu0 %246  ;;  %v331_v44 = vmul.f32 %v3015_v18, %v2985_v58  ;;  %v335_v54 = vmul.f32 %v3015_v18, %v2990_v60 }
  0x99   :  { %v261_v55 = vmul.f32 %v247_v4, %v2886_v11  ;;  %v262_v57 = vmul.f32 %v247_v4, %v2893_v13  ;;  %v263_v63 = vmul.f32 %v247_v4, %v2888_v12  ;;  %v264_v10 = vmul.f32 %v247_v4, %v2907_v17 }
  0x9a   :  { %v169_v14 = vpop.permute.xlu1 %168  ;;  %v347_v21 = vadd.f32 %v331_v44, %v283_v41 }
  0x9b   :  { %v179_v19 = vsel %vm176_vm6, %v169_v14, %v171_v40  ;;  %v180_v22 = vsel %vm176_vm6, %v175_v51, %v169_v14 }
  0x9c   :  { %v181_v23 = vmul.f32 %v3007_v7, %v179_v19  ;;  %v184_v40 = vmul.f32 %v3012_v16, %v180_v22 }
  0x9d   :  { %v207_v31 = vpop.permute.xlu0 %206 }
  0x9e   :  { %v197_v24 = vpop.permute.xlu1 %196  ;;  %v3043_v26 = vrot.slane %v181_v23, %v2877_v6  ;;  %v237_v51 = vmul.f32 %v212_v61, %v207_v31  ;;  %v238_v52 = vmul.f32 %v2988_v59, %v207_v31  ;;  %v239_v36 = vmul.f32 %v2995_v62, %v207_v31 }
  0x9f   :  { %v230_v5 = vmul.f32 %v2988_v59, %v197_v24  ;;  %v320_v14 = vrot.slane %v184_v40, %v2877_v6  ;;  %v240_v19 = vmul.f32 %v2999_v0, %v207_v31  ;;  %v229_v22 = vmul.f32 %v212_v61, %v197_v24 }
  0xa0   :  { %v231_v23 = vmul.f32 %v2995_v62, %v197_v24  ;;  %v232_v25 = vmul.f32 %v2999_v0, %v197_v24  ;;  %v329_v27 = vmul.f32 %v3043_v26, %v2985_v58  ;;  %v286_v29 = vadd.f32 %v270_v34, %v238_v52 }
  0xa1   :  { %v192_v53 = vpop.permute.xlu0 %191  ;;  %v287_v30 = vadd.f32 %v271_v35, %v239_v36  ;;  %v285_v32 = vadd.f32 %v269_v33, %v237_v51  ;;  %v333_v4 = vmul.f32 %v3043_v26, %v2990_v60  ;;  %v278_v41 = vadd.f32 %v262_v57, %v230_v5 }
  0xa2   :  { %v225_v40 = vmul.f32 %v212_v61, %v192_v53  ;;  %v226_v31 = vmul.f32 %v2988_v59, %v192_v53  ;;  %v227_v44 = vmul.f32 %v2995_v62, %v192_v53  ;;  %v332_v8 = vmul.f32 %v320_v14, %v2985_v58 }
  0xa3   :  { %v243_v20 = vpop.permute.xlu1 %242  ;;  %v228_v34 = vmul.f32 %v2999_v0, %v192_v53  ;;  %v345_v52 = vadd.f32 %v329_v27, %v281_v46  ;;  %v350_v59 = vadd.f32 %v334_v49, %v286_v29  ;;  %v349_v36 = vadd.f32 %v333_v4, %v285_v32 }
  0xa4   :  { %v258_v37 = vmul.f32 %v243_v20, %v2893_v13  ;;  %v259_v24 = vmul.f32 %v243_v20, %v2888_v12  ;;  %v257_v61 = vmul.f32 %v243_v20, %v2886_v11  ;;  %v260_v62 = vmul.f32 %v243_v20, %v2907_v17 }
  0xa5   :  { %v370_v28 = vpop.permute.xlu0 %369  ;;  %v279_v12 = vadd.f32 %v263_v63, %v231_v23  ;;  %v277_v13 = vadd.f32 %v261_v55, %v229_v22  ;;  %v288_v58 = vadd.f32 %v272_v39, %v240_v19  ;;  %v336_v46 = vmul.f32 %v320_v14, %v2990_v60 }
  0xa6   :  { %v386_v2 = vadd.f32 %v370_v28, %v346_v48  ;;  %v387_v51 = vadd.f32 %v370_v28, %v347_v21  ;;  %v351_v48 = vadd.f32 %v335_v54, %v287_v30  ;;  %v385_v57 = vadd.f32 %v370_v28, %v345_v52 }
  0xa7   :  { %v274_v0 = vadd.f32 %v258_v37, %v226_v31  ;;  %v275_v53 = vadd.f32 %v259_v24, %v227_v44  ;;  %v280_v49 = vadd.f32 %v264_v10, %v232_v25  ;;  %v273_v37 = vadd.f32 %v257_v61, %v225_v40 }
  0xa8   :  { %v291_v35 = vpop.permute.xlu1 %290  ;;  %v3070_v33 = vmax.f32 %v386_v2, 0.0  ;;  %v348_v2 = vadd.f32 %v332_v8, %v284_v50  ;;  %v3076_v21 = vmax.f32 %v387_v51, 0.0  ;;  %v352_v25 = vadd.f32 %v336_v46, %v288_v58 }
  0xa9   :  { %v322_v11 = vmul.f32 %v3002_v1, %v291_v35  ;;  %v323_v8 = vmul.f32 %v3015_v18, %v291_v35  ;;  %v321_v39 = vmul.f32 %v3043_v26, %v291_v35  ;;  %v324_v60 = vmul.f32 %v320_v14, %v291_v35  ;;  %v365_v22 = vpop.permute.xlu0 %364 }
  0xaa   :  { %485 = vrot.lane.b32.xlu1 %v3070_v33, %s2779_s24  ;;  %v388_v50 = vadd.f32 %v370_v28, %v348_v2  ;;  %v276_v27 = vadd.f32 %v260_v62, %v228_v34 }
  0xab   :  { %v338_v23 = vadd.f32 %v322_v11, %v274_v0  ;;  %v337_v44 = vadd.f32 %v321_v39, %v273_v37  ;;  %v571_v39 = vld [vmem:[%s4184_s4 + $0x10] sm:$0xff] }
  0xac   :  { %v295_v5 = vpop.permute.xlu1 %294  ;;  %v340_v24 = vadd.f32 %v324_v60, %v276_v27  ;;  %v575_v60 = vld [vmem:[%s4184_s4 + $0x30] sm:$0xff] }
  0xad   :  { %v326_v17 = vmul.f32 %v3002_v1, %v295_v5  ;;  %v327_v54 = vmul.f32 %v3015_v18, %v295_v5  ;;  %v325_v63 = vmul.f32 %v3043_v26, %v295_v5  ;;  %v328_v55 = vmul.f32 %v320_v14, %v295_v5 }
  0xae   :  { %493 = vrot.lane.b32.xlu1 %v3076_v21, %s2779_s24  ;;  %v401_v1 = vmax.f32 %v385_v57, 0.0  ;;  %v3088_v14 = vmax.f32 %v388_v50, 0.0  ;;  %v570_v50 = vld [vmem:[%s4184_s4 + $0x8] sm:$0xff] }
  0xaf   :  { %v342_v19 = vadd.f32 %v326_v17, %v278_v41  ;;  %v341_v20 = vadd.f32 %v325_v63, %v277_v13  ;;  %v344_v10 = vadd.f32 %v328_v55, %v280_v49  ;;  %v343_v32 = vadd.f32 %v327_v54, %v279_v12 }
  0xb0   :  { %v339_v41 = vadd.f32 %v323_v8, %v275_v53 }
  0xb1   :  { %v375_v29 = vpop.permute.xlu1 %374  ;;  %v382_v30 = vadd.f32 %v365_v22, %v342_v19  ;;  %v381_v4 = vadd.f32 %v365_v22, %v341_v20  ;;  %v384_v31 = vadd.f32 %v365_v22, %v344_v10  ;;  %v383_v12 = vadd.f32 %v365_v22, %v343_v32  ;;  %v573_v19 = vld [vmem:[%s4184_s4 + $0x20] sm:$0xff]  ;;  %v572_v20 = vld [vmem:[%s4184_s4 + $0x18] sm:$0xff]  ;;  %v574_v10 = vld [vmem:[%s4184_s4 + $0x28] sm:$0xff] }
  0xb2   :  { %477 = vrot.lane.b32.xlu1 %v401_v1, %s2779_s24  ;;  %v390_v18 = vadd.f32 %v375_v29, %v350_v59  ;;  %v391_v40 = vadd.f32 %v375_v29, %v351_v48  ;;  %v389_v26 = vadd.f32 %v375_v29, %v349_v36  ;;  %v392_v28 = vadd.f32 %v375_v29, %v352_v25  ;;  %v576_v22 = vld [vmem:[%s4184_s4 + $0x38] sm:$0xff] }
  0xb3   :  { %v398_v62 = vmax.f32 %v382_v30, 0.0  ;;  %v397_v13 = vmax.f32 %v381_v4, 0.0  ;;  %v3094_v58 = vmax.f32 %v384_v31, 0.0  ;;  %v3110_v54 = vmax.f32 %v383_v12, 0.0 }
  0xb4   :  { %v406_v35 = vmax.f32 %v390_v18, 0.0  ;;  %v3090_v51 = vmax.f32 %v391_v40, 0.0  ;;  %v405_v34 = vmax.f32 %v389_v26, 0.0  ;;  %v3092_v52 = vmax.f32 %v392_v28, 0.0 }
  0xb5   :  { %v360_v61 = vpop.permute.xlu1 %359 }
  0xb6   :  { %487 = vrot.lane.b32.xlu0 %v406_v35, %s2779_s24  ;;  %v378_v59 = vadd.f32 %v360_v61, %v338_v23  ;;  %v379_v48 = vadd.f32 %v360_v61, %v339_v41  ;;  %v377_v36 = vadd.f32 %v360_v61, %v337_v44  ;;  %v380_v57 = vadd.f32 %v360_v61, %v340_v24 }
  0xb7   :  { %v3098_v0 = vpack.c.bf16 %v406_v35, %v3070_v33  ;;  %v3100_v53 = vpack.c.bf16 %v405_v34, %v401_v1  ;;  %v552_v2 = vpack.c.bf16 %v3092_v52, %v3088_v14  ;;  %v551_v5 = vpack.c.bf16 %v3090_v51, %v3076_v21 }
  0xb8   :  { %v394_v11 = vmax.f32 %v378_v59, 0.0  ;;  %v3106_v46 = vmax.f32 %v379_v48, 0.0  ;;  %v393_v49 = vmax.f32 %v377_v36, 0.0  ;;  %v3108_v17 = vmax.f32 %v380_v57, 0.0 }
  0xba   :  { %495 = vrot.lane.b32.xlu0 %v3090_v51, %s2779_s24  ;;  %481 = vrot.lane.b32.xlu1 %v394_v11, %s2779_s24  ;;  %v3115_v63 = vpack.c.bf16 %v398_v62, %v394_v11  ;;  %v3117_v55 = vpack.c.bf16 %v397_v13, %v393_v49  ;;  %v548_v8 = vpack.c.bf16 %v3094_v58, %v3108_v17 }
  0xbb   :  { %v547_v37 = vpack.c.bf16 %v3110_v54, %v3106_v46 }
  0xbe   :  { %479 = vrot.lane.b32.xlu0 %v405_v34, %s2779_s24  ;;  %489 = vrot.lane.b32.xlu1 %v3106_v46, %s2779_s24 }
  0xc2   :  { %483 = vrot.lane.b32.xlu0 %v398_v62, %s2779_s24  ;;  %473 = vrot.lane.b32.xlu1 %v393_v49, %s2779_s24 }
  0xc6   :  { %491 = vrot.lane.b32.xlu0 %v3110_v54, %s2779_s24  ;;  %413 = vrot.lane.b32.xlu1 %v401_v1, %s2778_s0 }
  0xca   :  { %475 = vrot.lane.b32.xlu0 %v397_v13, %s2779_s24  ;;  %421 = vrot.lane.b32.xlu1 %v3070_v33, %s2778_s0  ;;  %v569_v33 = vld [vmem:[%s4184_s4] sm:$0xff] }
  0xce   :  { %415 = vrot.lane.b32.xlu0 %v405_v34, %s2778_s0  ;;  %437 = vrot.lane.b32.xlu1 %v3088_v14, %s2778_s0 }
  0xd2   :  { %423 = vrot.lane.b32.xlu0 %v406_v35, %s2778_s0  ;;  %409 = vrot.lane.b32.xlu1 %v393_v49, %s2778_s0 }
  0xd6   :  { %439 = vrot.lane.b32.xlu0 %v3092_v52, %s2778_s0  ;;  %417 = vrot.lane.b32.xlu1 %v394_v11, %s2778_s0 }
  0xda   :  { %411 = vrot.lane.b32.xlu0 %v397_v13, %s2778_s0  ;;  %433 = vrot.lane.b32.xlu1 %v3108_v17, %s2778_s0 }
  0xde   :  { %419 = vrot.lane.b32.xlu0 %v398_v62, %s2778_s0  ;;  %501 = vrot.lane.b32.xlu1 %v3088_v14, %s2779_s24 }
  0xe2   :  { %435 = vrot.lane.b32.xlu0 %v3094_v58, %s2778_s0  ;;  %497 = vrot.lane.b32.xlu1 %v3108_v17, %s2779_s24 }
  0xe6   :  { %503 = vrot.lane.b32.xlu0 %v3092_v52, %s2779_s24  ;;  %429 = vrot.lane.b32.xlu1 %v3076_v21, %s2778_s0 }
  0xea   :  { %499 = vrot.lane.b32.xlu0 %v3094_v58, %s2779_s24  ;;  %425 = vrot.lane.b32.xlu1 %v3106_v46, %s2778_s0 }
  0xee   :  { %431 = vrot.lane.b32.xlu0 %v3090_v51, %s2778_s0  ;;  %579 = vperm.xlu1 %2704, %v569_v33  }
  0xf2   :  { %427 = vrot.lane.b32.xlu0 %v3110_v54, %s2778_s0  ;;  %589 = vperm.xlu1 %2704, %v571_v39  }
  0xf6   :  { %584 = vperm.xlu0 %2702, %v570_v50   ;;  %599 = vperm.xlu1 %2704, %v573_v19  }
  0xfa   :  { %594 = vperm.xlu0 %2702, %v572_v20   ;;  %609 = vperm.xlu1 %2704, %v575_v60  }
  0xfe   :  { %604 = vperm.xlu0 %2702, %v574_v10  }
 0x102   :  { %614 = vperm.xlu0 %2702, %v576_v22  }
 0x11c   :  { %v486_v1 = vpop.permute.xlu1 %485 }
 0x120   :  { %v3188_v23 = vpop.permute.xlu1 %493 }
 0x121   :  { %v511_v29 = vsel %vm176_vm6, %v486_v1, %v3188_v23 }
 0x122   :  { %v530_v31 = vmul.f32 %v2969_v47, %v511_v29 }
 0x124   :  { %v3190_v25 = vpop.permute.xlu1 %477 }
 0x125   :  { %v515_v40 = vsel %vm176_vm6, %v3190_v25, %v486_v1 }
 0x126   :  { %v529_v24 = vmul.f32 %v3007_v7, %v515_v40 }
 0x128   :  { %v488_v27 = vpop.permute.xlu0 %487 }
 0x12c   :  { %v3195_v30 = vpop.permute.xlu0 %495  ;;  %v482_v32 = vpop.permute.xlu1 %481 }
 0x12d   :  { %v512_v4 = vsel %vm176_vm6, %v488_v27, %v3195_v30 }
 0x12e   :  { %v534_v18 = vmul.f32 %v2969_v47, %v512_v4 }
 0x130   :  { %v3205_v26 = vpop.permute.xlu0 %479  ;;  %v3207_v28 = vpop.permute.xlu1 %489  ;;  %v558_v41 = vpack.c.bf16 %v534_v18, %v530_v31 }
 0x131   :  { %v516_v44 = vsel %vm176_vm6, %v3205_v26, %v488_v27  ;;  %v509_v12 = vsel %vm176_vm6, %v482_v32, %v3207_v28 }
 0x132   :  { %654 = vmatprep.subr.bf16.mxu0 %v558_v41  ;;  %2673 = vmatprep.subr.bf16.mxu1 %v558_v41  ;;  %v533_v35 = vmul.f32 %v3007_v7, %v516_v44  ;;  %v522_v36 = vmul.f32 %v2969_v47, %v509_v12 }
 0x134   :  { %v484_v34 = vpop.permute.xlu0 %483  ;;  %v3214_v61 = vpop.permute.xlu1 %473  ;;  %v557_v62 = vpack.c.bf16 %v533_v35, %v529_v24 }
 0x135   :  { %v513_v11 = vsel %vm176_vm6, %v3214_v61, %v482_v32 }
 0x136   :  { %655 = vmatpush1.bf16.msra.mxu0 %v557_v62  ;;  %2679 = vmatpush1.bf16.msra.mxu1 %v557_v62  ;;  %v521_v19 = vmul.f32 %v3007_v7, %v513_v11 }
 0x138   :  { %v3219_v13 = vpop.permute.xlu0 %491  ;;  %v414_v59 = vpop.permute.xlu1 %413 }
 0x139   :  { %v510_v48 = vsel %vm176_vm6, %v484_v34, %v3219_v13 }
 0x13a   :  { %v526_v57 = vmul.f32 %v2969_v47, %v510_v48 }
 0x13c   :  { %v3229_v49 = vpop.permute.xlu0 %475  ;;  %v3231_v33 = vpop.permute.xlu1 %421  ;;  %v554_v39 = vpack.c.bf16 %v526_v57, %v522_v36 }
 0x13d   :  { %v514_v50 = vsel %vm176_vm6, %v3229_v49, %v484_v34  ;;  %v451_v22 = vsel %vm159_vm1, %v414_v59, %v3231_v33 }
 0x13e   :  { %v525_v20 = vmul.f32 %v3007_v7, %v514_v50  ;;  %656 = vmatprep.subr.bf16.mxu0 %v554_v39  ;;  %2674 = vmatprep.subr.bf16.mxu1 %v554_v39  ;;  %v466_v29 = vmul.f32 %v2950_v38, %v451_v22 }
 0x140   :  { %v416_v47 = vpop.permute.xlu0 %415  ;;  %v3238_v60 = vpop.permute.xlu1 %437  ;;  %v553_v10 = vpack.c.bf16 %v525_v20, %v521_v19 }
 0x141   :  { %v455_v4 = vsel %vm159_vm1, %v3238_v60, %v414_v59 }
 0x142   :  { %657 = vmatpush1.bf16.msra.mxu0 %v553_v10  ;;  %2680 = vmatpush1.bf16.msra.mxu1 %v553_v10  ;;  %v465_v41 = vmul.f32 %v2956_v42, %v455_v4  ;;  %v4203_v4 = vmov 0.0  }
 0x143   :  { %658 = vmatprep.subr.bf16.mxu0 %v3098_v0  ;;  %2675 = vmatprep.subr.bf16.mxu1 %v3098_v0 }
 0x144   :  { %v3245_v1 = vpop.permute.xlu0 %423  ;;  %v410_v27 = vpop.permute.xlu1 %409 }
 0x145   :  { %v452_v7 = vsel %vm159_vm1, %v416_v47, %v3245_v1 }
 0x146   :  { %v470_v32 = vmul.f32 %v2950_v38, %v452_v7  ;;  %659 = vmatpush1.bf16.msra.mxu0 %v3100_v53  ;;  %2681 = vmatpush1.bf16.msra.mxu1 %v3100_v53 }
 0x147   :  { %660 = vmatprep.subr.bf16.mxu0 %v3115_v63  ;;  %2676 = vmatprep.subr.bf16.mxu1 %v3115_v63 }
 0x148   :  { %v3259_v0 = vpop.permute.xlu0 %439  ;;  %v3261_v31 = vpop.permute.xlu1 %417  ;;  %v542_v18 = vpack.c.bf16 %v470_v32, %v466_v29 }
 0x149   :  { %v456_v40 = vsel %vm159_vm1, %v3259_v0, %v416_v47  ;;  %v449_v35 = vsel %vm159_vm1, %v410_v27, %v3261_v31 }
 0x14a   :  { %v469_v53 = vmul.f32 %v2956_v42, %v456_v40  ;;  %661 = vmatpush1.bf16.msra.mxu0 %v3117_v55  ;;  %2682 = vmatpush1.bf16.msra.mxu1 %v3117_v55  ;;  %v458_v55 = vmul.f32 %v2950_v38, %v449_v35 }
 0x14b   :  { %662 = vmatprep.subr.bf16.mxu0 %v542_v18  ;;  %2677 = vmatprep.subr.bf16.mxu1 %v542_v18 }
 0x14c   :  { %v412_v63 = vpop.permute.xlu0 %411  ;;  %v3270_v44 = vpop.permute.xlu1 %433  ;;  %v541_v24 = vpack.c.bf16 %v469_v53, %v465_v41 }
 0x14d   :  { %v453_v48 = vsel %vm159_vm1, %v3270_v44, %v410_v27  ;;  %v3304_v27 = vld [vmem:[%s4183_s3] sm:$0xff]  }
 0x14e   :  { %663 = vmatpush1.bf16.msra.mxu0 %v541_v24  ;;  %2683 = vmatpush1.bf16.msra.mxu1 %v541_v24  ;;  %v457_v39 = vmul.f32 %v2956_v42, %v453_v48 }
 0x150   :  { %v3275_v34 = vpop.permute.xlu0 %419  ;;  %v502_v59 = vpop.permute.xlu1 %501 }
 0x151   :  { %v450_v62 = vsel %vm159_vm1, %v412_v63, %v3275_v34  ;;  %v519_v19 = vsel %vm176_vm6, %v502_v59, %v3190_v25 }
 0x152   :  { %v462_v12 = vmul.f32 %v2950_v38, %v450_v62  ;;  %v507_v38 = vsel %vm176_vm6, %v3188_v23, %v502_v59  ;;  %v532_v25 = vmul.f32 %v3012_v16, %v519_v19  ;;  %v2707_v59 = vld [vmem:[%s4183_s3 + $0x8] sm:$0xff]  }
 0x153   :  { %v531_v23 = vmul.f32 %v2981_v56, %v507_v38 }
 0x154   :  { %v436_v36 = vpop.permute.xlu0 %435  ;;  %v538_v57 = vpack.c.bf16 %v462_v12, %v458_v55  ;;  %v498_v20 = vpop.permute.xlu1 %497 }
 0x155   :  { %v454_v11 = vsel %vm159_vm1, %v436_v36, %v412_v63  ;;  %v517_v32 = vsel %vm176_vm6, %v498_v20, %v3214_v61 }
 0x156   :  { %v461_v50 = vmul.f32 %v2956_v42, %v454_v11  ;;  %664 = vmatprep.subr.bf16.mxu0 %v538_v57  ;;  %2678 = vmatprep.subr.bf16.mxu1 %v538_v57  ;;  %v524_v61 = vmul.f32 %v3012_v16, %v517_v32 }
 0x158   :  { %v504_v47 = vpop.permute.xlu0 %503  ;;  %v537_v10 = vpack.c.bf16 %v461_v50, %v457_v39  ;;  %v430_v12 = vpop.permute.xlu1 %429 }
 0x159   :  { %v508_v22 = vsel %vm176_vm6, %v3195_v30, %v504_v47  ;;  %v520_v42 = vsel %vm176_vm6, %v504_v47, %v3205_v26  ;;  %v3313_v30 = vld [vmem:[%s4183_s3 + $0x10] sm:$0xff]   ;;  %v505_v26 = vsel %vm176_vm6, %v3207_v28, %v498_v20  ;;  %v443_v57 = vsel %vm159_vm1, %v430_v12, %v3238_v60 }
 0x15a   :  { %v535_v7 = vmul.f32 %v2981_v56, %v508_v22  ;;  %v536_v29 = vmul.f32 %v3012_v16, %v520_v42  ;;  %665 = vmatpush1.bf16.msra.mxu0 %v537_v10  ;;  %2684 = vmatpush1.bf16.msra.mxu1 %v537_v10  ;;  %v523_v28 = vmul.f32 %v2981_v56, %v505_v26  ;;  %v2781_v42 = vmov 1983009808  }
 0x15b   :  { %2661 = vmatprep.subr.bf16.mxu0 %v4203_v4  ;;  %v447_v52 = vsel %vm159_vm1, %v3231_v33, %v430_v12 }
 0x15c   :  { %v559_v18 = vpack.c.bf16 %v535_v7, %v531_v23  ;;  %v500_v40 = vpop.permute.xlu0 %499  ;;  %v560_v41 = vpack.c.bf16 %v536_v29, %v532_v25  ;;  %v426_v11 = vpop.permute.xlu1 %425  ;;  %v467_v33 = vmul.f32 %v2959_v43, %v447_v52  ;;  %v2782_v23 = vmov 1934713408  }
 0x15d   :  { %v506_v53 = vsel %vm176_vm6, %v3219_v13, %v500_v40  ;;  %v518_v63 = vsel %vm176_vm6, %v500_v40, %v3229_v49  ;;  %2585 = vmatmul.mubr.msk.bf16.vlgmr.msra.gmra.mxu0 %vm637_vm10, %v3304_v27  ;;  %2587 = vmatmul.mubr.msk.bf16.vlgmr.msra.gmra.mxu1 %vm637_vm10, %v3313_v30  ;;  %v4204_v13 = vmov 0   ;;  %v441_v60 = vsel %vm159_vm1, %v426_v11, %v3270_v44 }
 0x15e   :  { %v527_v24 = vmul.f32 %v2981_v56, %v506_v53  ;;  %v528_v35 = vmul.f32 %v3012_v16, %v518_v63  ;;  %727 = vmatprep.subr.bf16.mxu1 %v560_v41  ;;  %692 = vmatprep.mubr.bf16.mxu0 %v4204_v13  ;;  %v2708_v56 = vld [vmem:[%s4183_s3 + $0x18] sm:$0xff]   ;;  %v445_v58 = vsel %vm159_vm1, %v3261_v31, %v426_v11  ;;  %v863_v25 = vunpack.c.l.s4 %v2782_v23 }
 0x15f   :  { %728 = vmatpush1.bf16.msra.mxu1 %v559_v18  ;;  %712 = vmatprep.mubr.bf16.mxu1 %v4204_v13  ;;  %v460_v17 = vmul.f32 %v2964_v45, %v441_v60 }
 0x160   :  { %v555_v62 = vpack.c.bf16 %v527_v24, %v523_v28  ;;  %v432_v49 = vpop.permute.xlu0 %431  ;;  %v556_v55 = vpack.c.bf16 %v528_v35, %v524_v61  ;;  %v864_v18 = vunpack.c.0.s8 %v863_v25 }
 0x161   :  { %v444_v16 = vsel %vm159_vm1, %v432_v49, %v3259_v0  ;;  %v448_v39 = vsel %vm159_vm1, %v3245_v1, %v432_v49 }
 0x162   :  { %729 = vmatprep.subr.bf16.mxu1 %v556_v55  ;;  %v472_v0 = vmul.f32 %v2964_v45, %v444_v16  ;;  %v471_v1 = vmul.f32 %v2959_v43, %v448_v39  ;;  %v3426_v55 = vsub.s32 %v864_v18, %v2870_v3 }
 0x163   :  { %730 = vmatpush1.bf16.msra.mxu1 %v555_v62 }
 0x164   :  { %v428_v48 = vpop.permute.xlu0 %427  ;;  %731 = vmatprep.subr.bf16.mxu1 %v552_v2  ;;  %v468_v2 = vmul.f32 %v2964_v45, %v443_v57 }
 0x165   :  { %2586 = vmatmul.mubr.msk.bf16.gmra.mxu0 %vm637_vm10, %v2707_v59  ;;  %2588 = vmatmul.mubr.msk.bf16.gmra.mxu1 %vm637_vm10, %v2708_v56  ;;  %v442_v14 = vsel %vm159_vm1, %v428_v48, %v436_v36  ;;  %v446_v21 = vsel %vm159_vm1, %v3275_v34, %v428_v48  ;;  %v459_v36 = vmul.f32 %v2959_v43, %v445_v58  ;;  %vm2036_vm1 = vcmask 1045509  }
 0x166   :  { %755 = vmatprep.mubr.bf16.mxu1 %v4204_v13  ;;  %v464_v51 = vmul.f32 %v2964_v45, %v442_v14  ;;  %v463_v44 = vmul.f32 %v2959_v43, %v446_v21  ;;  %2669 = vmatprep.mubr.msk.bf16.mxu0 %vm2783_vm12, %v4203_v4 }
 0x167   :  { %732 = vmatpush1.bf16.msra.mxu1 %v551_v5  ;;  %v544_v5 = vpack.c.bf16 %v472_v0, %v468_v2 }
 0x168   :  { %733 = vmatprep.subr.bf16.mxu1 %v548_v8  ;;  %v543_v8 = vpack.c.bf16 %v471_v1, %v467_v33  ;;  %v540_v34 = vpack.c.bf16 %v464_v51, %v460_v17  ;;  %v539_v50 = vpack.c.bf16 %v463_v44, %v459_v36 }
 0x169   :  { %v580_v31 = vpop.permute.xlu1 %579 }
 0x16b   :  { %734 = vmatpush1.bf16.msra.mxu1 %v547_v37 }
 0x16c   :  { %735 = vmatprep.subr.bf16.mxu1 %v544_v5 }
 0x16d   :  { %v3402_v47 = vpop.permute.xlu1 %589 }
 0x16f   :  { %736 = vmatpush1.bf16.msra.mxu1 %v543_v8 }
 0x170   :  { %737 = vmatprep.subr.bf16.mxu1 %v540_v34 }
 0x171   :  { %v3400_v20 = vpop.permute.xlu0 %584  ;;  %v3406_v32 = vpop.permute.xlu1 %599 }
 0x173   :  { %738 = vmatpush1.bf16.msra.mxu1 %v539_v50 }
 0x175   :  { %v3404_v7 = vpop.permute.xlu0 %594  ;;  %v3428_v12 = vpop.permute.xlu1 %609 }
 0x176   :  { %2589 = vmatmul.mubr.msk.bf16.vlgmr.msra.gmra.mxu1 %vm637_vm10, %v3304_v27  ;;  %v831_v27 = vunpack.c.l.s4 %v2781_v42 }
 0x177   :  { %765 = vmatprep.mubr.bf16.mxu1 %v4204_v13 }
 0x178   :  { %v832_v26 = vunpack.c.0.s8 %v831_v27 }
 0x179   :  { %v3414_v61 = vpop.permute.xlu0 %604 }
 0x17a   :  { %v3412_v28 = vsub.s32 %v832_v26, %v2870_v3 }
 0x17d   :  { %v3446_v58 = vpop.permute.xlu0 %614 }
 0x17e   :  { %2590 = vmatmul.mubr.msk.bf16.gmra.mxu1 %vm637_vm10, %v2707_v59 }
 0x17f   :  { %775 = vmatprep.mubr.bf16.mxu1 %v4204_v13 }
 0x186   :  { %2591 = vmatmul.mubr.msk.bf16.gmra.mxu1 %vm637_vm10, %v3313_v30 }
 0x187   :  { %785 = vmatprep.mubr.bf16.mxu1 %v4204_v13 }
 0x18e   :  { %2592 = vmatmul.mubr.msk.bf16.gmra.mxu1 %vm637_vm10, %v2708_v56 }
 0x18f   :  { %2341 = vmatprep.mubr.bf16.mxu1 %v4204_v13 }
 0x21d   :  { %v704_v9 = vpop.f32.mrf.mxu1  ;;  %v684_v45 = vpop.f32.mrf.mxu0 }
 0x21e   :  { %v685_v40 = vadd.f32 %v684_v45, %v580_v31  ;;  %v3409_v41 = vadd.f32 %v704_v9, %v3406_v32 }
 0x21f   :  { %v706_v43 = vpop.f32.mrf.mxu1  ;;  %v686_v54 = vpop.f32.mrf.mxu0 }
 0x220   :  { %v687_v24 = vadd.f32 %v686_v54, %v580_v31  ;;  %v3417_v35 = vadd.f32 %v706_v43, %v3406_v32  ;;  %v796_v59 = vmax.f32 %v685_v40, 0.0  ;;  %v812_v56 = vmax.f32 %v3409_v41, 0.0 }
 0x221   :  { %v708_v46 = vpop.f32.mrf.mxu1  ;;  %v688_v38 = vpop.f32.mrf.mxu0 }
 0x222   :  { %v3420_v13 = vadd.f32 %v688_v38, %v3400_v20  ;;  %v3423_v62 = vadd.f32 %v708_v46, %v3414_v61  ;;  %v797_v1 = vmax.f32 %v687_v24, 0.0  ;;  %v813_v21 = vmax.f32 %v3417_v35, 0.0 }
 0x223   :  { %v710_v37 = vpop.f32.mrf.mxu1  ;;  %v690_v10 = vpop.f32.mrf.mxu0 }
 0x224   :  { %v691_v48 = vadd.f32 %v690_v10, %v3400_v20  ;;  %v3433_v57 = vadd.f32 %v710_v37, %v3414_v61  ;;  %v800_v51 = vmax.f32 %v3420_v13, 0.0  ;;  %v816_v5 = vmax.f32 %v3423_v62, 0.0 }
 0x225   :  { %v714_v19 = vpop.f32.mrf.mxu1  ;;  %v694_v29 = vpop.f32.mrf.mxu0 }
 0x226   :  { %v695_v11 = vadd.f32 %v694_v29, %v3402_v47  ;;  %v3437_v39 = vadd.f32 %v714_v19, %v3428_v12  ;;  %v801_v36 = vmax.f32 %v691_v48, 0.0  ;;  %v817_v50 = vmax.f32 %v3433_v57, 0.0 }
 0x227   :  { %v716_v22 = vpop.f32.mrf.mxu1  ;;  %v696_v53 = vpop.f32.mrf.mxu0 }
 0x228   :  { %v697_v3 = vadd.f32 %v696_v53, %v3402_v47  ;;  %v3441_v52 = vadd.f32 %v716_v22, %v3428_v12  ;;  %v804_v9 = vmax.f32 %v695_v11, 0.0  ;;  %v820_v46 = vmax.f32 %v3437_v39, 0.0 }
 0x229   :  { %v718_v30 = vpop.f32.mrf.mxu1  ;;  %v698_v0 = vpop.f32.mrf.mxu0 }
 0x22a   :  { %v3449_v17 = vadd.f32 %v698_v0, %v3404_v7  ;;  %v3454_v43 = vadd.f32 %v718_v30, %v3446_v58  ;;  %v805_v54 = vmax.f32 %v697_v3, 0.0  ;;  %v821_v37 = vmax.f32 %v3441_v52, 0.0 }
 0x22b   :  { %v720_v63 = vpop.f32.mrf.mxu1 }
 0x22c   :  { %v808_v23 = vmax.f32 %v3449_v17, 0.0  ;;  %v824_v26 = vmax.f32 %v3454_v43, 0.0 }
 0x236   :  { %v757_v49 = vpop.f32.mrf.mxu1 }
 0x237   :  { %v758_v16 = vadd.f32 %v757_v49, %v580_v31 }
 0x238   :  { %v759_v14 = vpop.f32.mrf.mxu1 }
 0x239   :  { %v798_v2 = vmax.f32 %v758_v16, 0.0  ;;  %v760_v60 = vadd.f32 %v759_v14, %v580_v31  ;;  %v700_v31 = vpop.f32.mrf.mxu0  ;;  %v3467_v16 = vadd.f32 %v720_v63, %v3446_v58 }
 0x23a   :  { %v761_v33 = vpop.f32.mrf.mxu1  ;;  %v701_v18 = vadd.f32 %v700_v31, %v3404_v7 }
 0x23b   :  { %v828_v8 = vcombine.low %v796_v59, %v798_v2  ;;  %v799_v44 = vmax.f32 %v760_v60, 0.0  ;;  %v762_v34 = vadd.f32 %v761_v33, %v3400_v20  ;;  %v829_v19 = vcombine.high %v796_v59, %v798_v2 }
 0x23c   :  { %v763_v45 = vpop.f32.mrf.mxu1 }
 0x23d   :  { %v844_v38 = vcombine.low %v797_v1, %v799_v44  ;;  %v845_v10 = vcombine.high %v797_v1, %v799_v44  ;;  %v802_v22 = vmax.f32 %v762_v34, 0.0  ;;  %v764_v42 = vadd.f32 %v763_v45, %v3400_v20 }
 0x23e   :  { %v767_v27 = vpop.f32.mrf.mxu1  ;;  %v836_v25 = vrot.slane %v828_v8, %v3412_v28  ;;  %v3470_v48 = vrot.slane %v829_v19, %v3412_v28 }
 0x23f   :  { %v852_v29 = vrot.slane %v844_v38, %v3412_v28  ;;  %v768_v30 = vadd.f32 %v767_v27, %v3402_v47  ;;  %v896_v40 = vcombine.low %v800_v51, %v802_v22  ;;  %v803_v53 = vmax.f32 %v764_v42, 0.0 }
 0x240   :  { %v769_v24 = vpop.f32.mrf.mxu1  ;;  %v3473_v11 = vrot.slane %v845_v10, %v3412_v28  ;;  %v897_v3 = vcombine.high %v800_v51, %v802_v22  ;;  %v809_v10 = vmax.f32 %v701_v18, 0.0 }
 0x241   :  { %v806_v13 = vmax.f32 %v768_v30, 0.0  ;;  %v770_v49 = vadd.f32 %v769_v24, %v3402_v47  ;;  %v861_v20 = vcombine.high %v836_v25, %v852_v29  ;;  %v860_v59 = vcombine.low %v836_v25, %v852_v29 }
 0x242   :  { %v912_v0 = vcombine.low %v801_v36, %v803_v53  ;;  %v771_v14 = vpop.f32.mrf.mxu1  ;;  %v913_v2 = vcombine.high %v801_v36, %v803_v53  ;;  %v3483_v44 = vrot.slane %v896_v40, %v3412_v28  ;;  %v3494_v22 = vrot.slane %v897_v3, %v3412_v28 }
 0x243   :  { %v807_v60 = vmax.f32 %v770_v49, 0.0  ;;  %v772_v1 = vadd.f32 %v771_v14, %v3404_v7  ;;  %v964_v33 = vcombine.low %v804_v9, %v806_v13  ;;  %v965_v47 = vcombine.high %v804_v9, %v806_v13 }
 0x244   :  { %v773_v17 = vpop.f32.mrf.mxu1  ;;  %v3477_v8 = vrot.slane %v861_v20, %v3426_v55  ;;  %v3480_v63 = vrot.slane %v860_v59, %v3426_v55  ;;  %v3486_v34 = vrot.slane %v912_v0, %v3412_v28  ;;  %v3497_v42 = vrot.slane %v913_v2, %v3412_v28 }
 0x245   :  { %v980_v51 = vcombine.low %v805_v54, %v807_v60  ;;  %v981_v36 = vcombine.high %v805_v54, %v807_v60  ;;  %v810_v45 = vmax.f32 %v772_v1, 0.0  ;;  %v774_v31 = vadd.f32 %v773_v17, %v3404_v7 }
 0x246   :  { %v777_v38 = vpop.f32.mrf.mxu1  ;;  %v1379_v9 = vsel %vm1372_vm11, %v3477_v8, -inf  ;;  %v1373_v19 = vsel %vm1372_vm11, %v3480_v63, -inf  ;;  %v3501_v7 = vrot.slane %v964_v33, %v3412_v28  ;;  %v3504_v54 = vrot.slane %v965_v47, %v3412_v28 }
 0x247   :  { %v778_v27 = vadd.f32 %v777_v38, %v3406_v32  ;;  %1380 = vmax.xlane.f32.xlu0 %v1379_v9  ;;  %1374 = vmax.xlane.f32.xlu1 %v1373_v19  ;;  %v811_v25 = vmax.f32 %v774_v31, 0.0  ;;  %v876_v30 = vcombine.low %v3470_v48, %v3473_v11  ;;  %v3509_v18 = vrot.slane %v980_v51, %v3412_v28 }
 0x248   :  { %v779_v29 = vpop.f32.mrf.mxu1  ;;  %v929_v24 = vcombine.high %v3483_v44, %v3486_v34  ;;  %v3515_v13 = vrot.slane %v981_v36, %v3412_v28  ;;  %v3517_v49 = vcombine.low %v808_v23, %v810_v45  ;;  %v3519_v20 = vcombine.high %v808_v23, %v810_v45 }
 0x249   :  { %v814_v40 = vmax.f32 %v778_v27, 0.0  ;;  %v780_v53 = vadd.f32 %v779_v29, %v3406_v32  ;;  %v877_v0 = vcombine.high %v3470_v48, %v3473_v11  ;;  %v3528_v60 = vcombine.low %v809_v10, %v811_v25 }
 0x24a   :  { %v781_v59 = vpop.f32.mrf.mxu1  ;;  %v3530_v1 = vcombine.high %v809_v10, %v811_v25  ;;  %v3533_v23 = vrot.slane %v876_v30, %v3426_v55  ;;  %v3536_v33 = vrot.slane %v929_v24, %v3426_v55  ;;  %v825_v38 = vmax.f32 %v3467_v16, 0.0 }
 0x24b   :  { %v1100_v14 = vcombine.low %v812_v56, %v814_v40  ;;  %v1101_v32 = vcombine.high %v812_v56, %v814_v40  ;;  %v815_v3 = vmax.f32 %v780_v53, 0.0  ;;  %v782_v2 = vadd.f32 %v781_v59, %v3414_v61 }
 0x24c   :  { %v783_v48 = vpop.f32.mrf.mxu1  ;;  %v1385_v51 = vsel %vm1372_vm11, %v3533_v23, -inf  ;;  %v1403_v36 = vsel %vm1372_vm11, %v3536_v33, -inf  ;;  %v3566_v27 = vrot.slane %v877_v0, %v3426_v55  ;;  %v944_v30 = vcombine.low %v3494_v22, %v3497_v42 }
 0x24d   :  { %v3539_v11 = vrot.slane %v1100_v14, %v3412_v28  ;;  %v3542_v41 = vrot.slane %v1101_v32, %v3412_v28  ;;  %v1116_v56 = vcombine.low %v813_v21, %v815_v3  ;;  %v1117_v47 = vcombine.high %v813_v21, %v815_v3  ;;  %1386 = vmax.xlane.f32.xlu0 %v1385_v51 }
 0x24e   :  { %v818_v17 = vmax.f32 %v782_v2, 0.0  ;;  %v784_v45 = vadd.f32 %v783_v48, %v3414_v61  ;;  %v787_v31 = vpop.f32.mrf.mxu1  ;;  %1404 = vmax.xlane.f32.xlu1 %v1403_v36  ;;  %v952_v32 = vrot.slane %v944_v30, %v3426_v55 }
 0x24f   :  { %v3555_v9 = vrot.slane %v1116_v56, %v3412_v28  ;;  %v3558_v19 = vrot.slane %v1117_v47, %v3412_v28  ;;  %v788_v35 = vadd.f32 %v787_v31, %v3428_v12  ;;  %v945_v47 = vcombine.high %v3494_v22, %v3497_v42 }
 0x250   :  { %v1168_v21 = vcombine.low %v816_v5, %v818_v17  ;;  %v1169_v10 = vcombine.high %v816_v5, %v818_v17  ;;  %v819_v61 = vmax.f32 %v784_v45, 0.0  ;;  %v789_v16 = vpop.f32.mrf.mxu1  ;;  %v928_v22 = vcombine.low %v3483_v44, %v3486_v34 }
 0x251   :  { %v1132_v25 = vcombine.low %v3539_v11, %v3555_v9  ;;  %v822_v29 = vmax.f32 %v788_v35, 0.0  ;;  %v790_v40 = vadd.f32 %v789_v16, %v3428_v12  ;;  %v1391_v12 = vsel %vm1372_vm11, %v3566_v27, -inf }
 0x252   :  { %v3574_v53 = vrot.slane %v1168_v21, %v3412_v28  ;;  %v3577_v62 = vrot.slane %v1169_v10, %v3412_v28  ;;  %v1184_v5 = vcombine.low %v817_v50, %v819_v61  ;;  %v1185_v24 = vcombine.high %v817_v50, %v819_v61  ;;  %v791_v59 = vpop.f32.mrf.mxu1  ;;  %1392 = vmax.xlane.f32.xlu0 %v1391_v12 }
 0x253   :  { %v1236_v0 = vcombine.low %v820_v46, %v822_v29  ;;  %v1237_v14 = vcombine.high %v820_v46, %v822_v29  ;;  %v823_v57 = vmax.f32 %v790_v40, 0.0  ;;  %v792_v50 = vadd.f32 %v791_v59, %v3446_v58 }
 0x254   :  { %v3591_v3 = vrot.slane %v1184_v5, %v3412_v28  ;;  %v3594_v2 = vrot.slane %v1185_v24, %v3412_v28  ;;  %v793_v48 = vpop.f32.mrf.mxu1  ;;  %v1409_v46 = vsel %vm1372_vm11, %v952_v32, -inf  ;;  %v959_v31 = vrot.slane %v945_v47, %v3426_v55 }
 0x255   :  { %v3598_v56 = vrot.slane %v1236_v0, %v3412_v28  ;;  %v3601_v39 = vrot.slane %v1237_v14, %v3412_v28  ;;  %1410 = vmax.xlane.f32.xlu1 %v1409_v46  ;;  %v1252_v51 = vcombine.low %v821_v37, %v823_v57  ;;  %v1253_v36 = vcombine.high %v821_v37, %v823_v57 }
 0x256   :  { %v1200_v17 = vcombine.low %v3574_v53, %v3591_v3  ;;  %v826_v45 = vmax.f32 %v792_v50, 0.0  ;;  %v892_v35 = vcombine.high %v3480_v63, %v4203_v4  ;;  %v794_v21 = vadd.f32 %v793_v48, %v3446_v58 }
 0x257   :  { %v3619_v42 = vrot.slane %v1252_v51, %v3412_v28  ;;  %v3622_v10 = vrot.slane %v1253_v36, %v3412_v28  ;;  %v1415_v61 = vsel %vm1372_vm11, %v959_v31, -inf  ;;  %v936_v16 = vrot.slane %v928_v22, %v3426_v55 }
 0x258   :  { %v1304_v52 = vcombine.low %v824_v26, %v826_v45  ;;  %v1305_v37 = vcombine.high %v824_v26, %v826_v45  ;;  %v1376_v63 = vsel %vm1372_vm11, %v892_v35, -inf  ;;  %v827_v58 = vmax.f32 %v794_v21, 0.0 }
 0x259   :  { %v1268_v44 = vcombine.low %v3598_v56, %v3619_v42  ;;  %1416 = vmax.xlane.f32.xlu1 %v1415_v61  ;;  %1377 = vmax.xlane.f32.xlu0 %v1376_v63  ;;  %v960_v30 = vcombine.high %v936_v16, %v4203_v4  ;;  %v893_v40 = vcombine.high %v3477_v8, %v4203_v4  ;;  %v1397_v61 = vsel %vm1372_vm11, %v936_v16, -inf }
 0x25a   :  { %v3634_v34 = vrot.slane %v1304_v52, %v3412_v28  ;;  %v3637_v29 = vrot.slane %v1305_v37, %v3412_v28  ;;  %v1320_v43 = vcombine.low %v825_v38, %v827_v58  ;;  %v1321_v26 = vcombine.high %v825_v38, %v827_v58 }
 0x25b   :  { %v1056_v5 = vrot.slane %v3528_v60, %v3412_v28  ;;  %v1063_v24 = vrot.slane %v3530_v1, %v3412_v28  ;;  %v961_v59 = vcombine.high %v3536_v33, %v4203_v4  ;;  %v894_v0 = vcombine.high %v3533_v23, %v4203_v4 }
 0x25c   :  { %v3651_v14 = vrot.slane %v1320_v43, %v3412_v28  ;;  %v3654_v38 = vrot.slane %v1321_v26, %v3412_v28  ;;  %v1400_v8 = vsel %vm1372_vm11, %v960_v30, -inf  ;;  %v1382_v12 = vsel %vm1372_vm11, %v893_v40, -inf }
 0x25d   :  { %v1040_v60 = vrot.slane %v3517_v49, %v3412_v28  ;;  %v1047_v1 = vrot.slane %v3519_v20, %v3412_v28  ;;  %1401 = vmax.xlane.f32.xlu1 %v1400_v8  ;;  %1383 = vmax.xlane.f32.xlu0 %v1382_v12  ;;  %v962_v23 = vcombine.high %v952_v32, %v4203_v4  ;;  %v1406_v57 = vsel %vm1372_vm11, %v961_v59, -inf }
 0x25e   :  { %v1336_v33 = vcombine.low %v3634_v34, %v3651_v14  ;;  %v895_v50 = vcombine.high %v3566_v27, %v4203_v4  ;;  %v996_v48 = vcombine.low %v3501_v7, %v3509_v18  ;;  %v997_v49 = vcombine.high %v3501_v7, %v3509_v18 }
 0x25f   :  { %v1065_v46 = vcombine.high %v1040_v60, %v1056_v5  ;;  %v1080_v28 = vcombine.low %v1047_v1, %v1063_v24  ;;  %v1012_v20 = vcombine.low %v3504_v54, %v3515_v13  ;;  %v1388_v32 = vsel %vm1372_vm11, %v894_v0, -inf }
 0x260   :  { %v1004_v47 = vrot.slane %v996_v48, %v3426_v55  ;;  %v1081_v51 = vcombine.high %v1047_v1, %v1063_v24  ;;  %v1013_v36 = vcombine.high %v3504_v54, %v3515_v13  ;;  %v963_v27 = vcombine.high %v959_v31, %v4203_v4 }
 0x261   :  { %1407 = vmax.xlane.f32.xlu1 %v1406_v57  ;;  %1389 = vmax.xlane.f32.xlu0 %v1388_v32  ;;  %v3680_v45 = vrot.slane %v1065_v46, %v3426_v55  ;;  %v1011_v7 = vrot.slane %v997_v49, %v3426_v55  ;;  %v3686_v21 = vrot.slane %v1080_v28, %v3426_v55  ;;  %v1412_v54 = vsel %vm1372_vm11, %v962_v23, -inf }
 0x262   :  { %v1095_v18 = vrot.slane %v1081_v51, %v3426_v55  ;;  %v1028_v35 = vcombine.high %v1004_v47, %v4203_v4  ;;  %v3689_v22 = vrot.slane %v1012_v20, %v3426_v55  ;;  %v1394_v13 = vsel %vm1372_vm11, %v895_v50, -inf }
 0x263   :  { %v3694_v31 = vrot.slane %v1013_v36, %v3426_v55  ;;  %v1064_v52 = vcombine.low %v1040_v60, %v1056_v5  ;;  %v1418_v37 = vsel %vm1372_vm11, %v963_v27, -inf  ;;  %v1421_v63 = vsel %vm1372_vm11, %v1004_v47, -inf }
 0x264   :  { %v1451_v58 = vsel %vm1372_vm11, %v3680_v45, -inf  ;;  %v1427_v43 = vsel %vm1372_vm11, %v1011_v7, -inf  ;;  %v1099_v30 = vcombine.high %v1095_v18, %v4203_v4  ;;  %v1424_v40 = vsel %vm1372_vm11, %v1028_v35, -inf }
 0x265   :  { %1413 = vmax.xlane.f32.xlu1 %v1412_v54  ;;  %1395 = vmax.xlane.f32.xlu0 %v1394_v13  ;;  %v1072_v26 = vrot.slane %v1064_v52, %v3426_v55  ;;  %v1457_v5 = vsel %vm1372_vm11, %v3686_v21, -inf  ;;  %v1433_v24 = vsel %vm1372_vm11, %v3689_v22, -inf  ;;  %v1140_v16 = vrot.slane %v1132_v25, %v3426_v55 }
 0x266   :  { %v3714_v59 = vsel %vm1372_vm11, %v1095_v18, -inf  ;;  %v3718_v0 = vsel %vm1372_vm11, %v3694_v31, -inf  ;;  %v3721_v8 = vcombine.high %v1011_v7, %v4203_v4  ;;  %v3724_v12 = vsel %vm1372_vm11, %v1099_v30, -inf }
 0x267   :  { %v3727_v60 = vsel %vm1372_vm11, %v1072_v26, -inf  ;;  %v1164_v25 = vcombine.high %v1140_v16, %v4203_v4  ;;  %v3731_v1 = vsel %vm1372_vm11, %v1140_v16, -inf  ;;  %v1201_v23 = vcombine.high %v3574_v53, %v3591_v3 }
 0x268   :  { %v3736_v57 = vcombine.high %v1072_v26, %v4203_v4  ;;  %v1133_v50 = vcombine.high %v3539_v11, %v3555_v9  ;;  %v1216_v48 = vcombine.low %v3577_v62, %v3594_v2  ;;  %v1148_v46 = vcombine.low %v3542_v41, %v3558_v19 }
 0x269   :  { %1419 = vmax.xlane.f32.xlu1 %v1418_v37  ;;  %1398 = vmax.xlane.f32.xlu0 %v1397_v61  ;;  %v3745_v49 = vsel %vm1372_vm11, %v1164_v25, -inf  ;;  %v1215_v28 = vrot.slane %v1201_v23, %v3426_v55  ;;  %v1217_v20 = vcombine.high %v3577_v62, %v3594_v2  ;;  %v1149_v32 = vcombine.high %v3542_v41, %v3558_v19 }
 0x26a   :  { %v1147_v47 = vrot.slane %v1133_v50, %v3426_v55  ;;  %v1224_v11 = vrot.slane %v1216_v48, %v3426_v55  ;;  %v1156_v9 = vrot.slane %v1148_v46, %v3426_v55  ;;  %v1208_v51 = vrot.slane %v1200_v17, %v3426_v55 }
 0x26b   :  { %v3760_v36 = vsel %vm1372_vm11, %v1215_v28, -inf  ;;  %v1231_v62 = vrot.slane %v1217_v20, %v3426_v55  ;;  %v1163_v41 = vrot.slane %v1149_v32, %v3426_v55  ;;  %v1233_v19 = vcombine.high %v1215_v28, %v4203_v4 }
 0x26c   :  { %v3766_v2 = vsel %vm1372_vm11, %v1147_v47, -inf  ;;  %v3769_v27 = vsel %vm1372_vm11, %v1224_v11, -inf  ;;  %v3772_v53 = vsel %vm1372_vm11, %v1156_v9, -inf  ;;  %v1232_v3 = vcombine.high %v1208_v51, %v4203_v4 }
 0x26d   :  { %1425 = vmax.xlane.f32.xlu1 %v1424_v40  ;;  %1422 = vmax.xlane.f32.xlu0 %v1421_v63  ;;  %v3776_v17 = vsel %vm1372_vm11, %v1231_v62, -inf  ;;  %v3779_v7 = vsel %vm1372_vm11, %v1163_v41, -inf  ;;  %v1165_v18 = vcombine.high %v1147_v47, %v4203_v4  ;;  %v3783_v35 = vsel %vm1372_vm11, %v1233_v19, -inf }
 0x26e   :  { %v3786_v54 = vsel %vm1372_vm11, %v1232_v3, -inf  ;;  %v1166_v13 = vcombine.high %v1156_v9, %v4203_v4  ;;  %v1234_v52 = vcombine.high %v1224_v11, %v4203_v4  ;;  %v1167_v37 = vcombine.high %v1163_v41, %v4203_v4 }
 0x26f   :  { %v3792_v61 = vsel %vm1372_vm11, %v1165_v18, -inf  ;;  %v1235_v63 = vcombine.high %v1231_v62, %v4203_v4  ;;  %v3796_v26 = vsel %vm1372_vm11, %v1208_v51, -inf  ;;  %v1276_v30 = vrot.slane %v1268_v44, %v3426_v55 }
 0x270   :  { %v3803_v40 = vsel %vm1372_vm11, %v1166_v13, -inf  ;;  %v3806_v16 = vsel %vm1372_vm11, %v1234_v52, -inf  ;;  %v1269_v44 = vcombine.high %v3598_v56, %v3619_v42  ;;  %v1352_v46 = vcombine.low %v3637_v29, %v3654_v38 }
 0x271   :  { %1452 = vmax.xlane.f32.xlu1 %v1451_v58  ;;  %1428 = vmax.xlane.f32.xlu0 %v1427_v43  ;;  %v3809_v58 = vsel %vm1372_vm11, %v1167_v37, -inf  ;;  %v1337_v43 = vcombine.high %v3634_v34, %v3651_v14  ;;  %v3814_v25 = vsel %vm1372_vm11, %v1235_v63, -inf  ;;  %v1300_v23 = vcombine.high %v1276_v30, %v4203_v4 }
 0x272   :  { %v3818_v50 = vsel %vm1372_vm11, %v1276_v30, -inf  ;;  %v1284_v28 = vcombine.low %v3601_v39, %v3622_v10  ;;  %v1353_v20 = vcombine.high %v3637_v29, %v3654_v38  ;;  %v1283_v47 = vrot.slane %v1269_v44, %v3426_v55 }
 0x273   :  { %v1351_v48 = vrot.slane %v1337_v43, %v3426_v55  ;;  %v3830_v32 = vsel %vm1372_vm11, %v1300_v23, -inf  ;;  %v1344_v56 = vrot.slane %v1336_v33, %v3426_v55  ;;  %v1285_v42 = vcombine.high %v3601_v39, %v3622_v10 }
 0x274   :  { %v1360_v9 = vrot.slane %v1352_v46, %v3426_v55  ;;  %v1292_v29 = vrot.slane %v1284_v28, %v3426_v55  ;;  %v1367_v38 = vrot.slane %v1353_v20, %v3426_v55  ;;  %v1097_v63 = vcombine.high %v3680_v45, %v4203_v4 }
 0x275   :  { %1458 = vmax.xlane.f32.xlu1 %v1457_v5  ;;  %1434 = vmax.xlane.f32.xlu0 %v1433_v24  ;;  %v1547_v11 = vsel %vm1372_vm11, %v1351_v48, -inf  ;;  %v1523_v5 = vsel %vm1372_vm11, %v1283_v47, -inf  ;;  %v1301_v24 = vcombine.high %v1283_v47, %v4203_v4  ;;  %v1368_v51 = vcombine.high %v1344_v56, %v4203_v4 }
 0x276   :  { %v1369_v34 = vcombine.high %v1351_v48, %v4203_v4  ;;  %v1553_v14 = vsel %vm1372_vm11, %v1360_v9, -inf  ;;  %v1529_v39 = vsel %vm1372_vm11, %v1292_v29, -inf  ;;  %v1559_v10 = vsel %vm1372_vm11, %v1367_v38, -inf }
 0x277   :  { %v1302_v33 = vcombine.high %v1292_v29, %v4203_v4  ;;  %v1526_v62 = vsel %vm1372_vm11, %v1301_v24, -inf  ;;  %v1544_v41 = vsel %vm1372_vm11, %v1368_v51, -inf  ;;  %v1541_v3 = vsel %vm1372_vm11, %v1344_v56, -inf }
 0x278   :  { %v1550_v19 = vsel %vm1372_vm11, %v1369_v34, -inf  ;;  %v1370_v13 = vcombine.high %v1360_v9, %v4203_v4  ;;  %v1299_v52 = vrot.slane %v1285_v42, %v3426_v55  ;;  %v1371_v37 = vcombine.high %v1367_v38, %v4203_v4 }
 0x279   :  { %1464 = vmax.xlane.f32.xlu1 %v3714_v59  ;;  %1440 = vmax.xlane.f32.xlu0 %v3718_v0  ;;  %v1532_v18 = vsel %vm1372_vm11, %v1302_v33, -inf  ;;  %v1448_v59 = vsel %vm1372_vm11, %v3736_v57, -inf  ;;  %v1430_v0 = vsel %vm1372_vm11, %v3721_v8, -inf  ;;  %v1030_v30 = vcombine.high %v3689_v22, %v4203_v4 }
 0x27a   :  { %v1556_v43 = vsel %vm1372_vm11, %v1370_v13, -inf  ;;  %v1535_v23 = vsel %vm1372_vm11, %v1299_v52, -inf  ;;  %v1562_v55 = vsel %vm1372_vm11, %v1371_v37, -inf  ;;  %v1303_v44 = vcombine.high %v1299_v52, %v4203_v4 }
 0x27b   :  { %v1454_v8 = vsel %vm1372_vm11, %v1097_v63, -inf  ;;  %v1436_v48 = vsel %vm1372_vm11, %v1030_v30, -inf  ;;  %v1098_v45 = vcombine.high %v3686_v21, %v4203_v4  ;;  %v1031_v22 = vcombine.high %v3694_v31, %v4203_v4 }
 0x27c   :  { %v1538_v57 = vsel %vm1372_vm11, %v1303_v44, -inf }
 0x27d   :  { %1449 = vmax.xlane.f32.xlu1 %v1448_v59  ;;  %1431 = vmax.xlane.f32.xlu0 %v1430_v0  ;;  %v1460_v46 = vsel %vm1372_vm11, %v1098_v45, -inf  ;;  %v1442_v28 = vsel %vm1372_vm11, %v1031_v22, -inf }
 0x281   :  { %1455 = vmax.xlane.f32.xlu1 %v1454_v8  ;;  %1437 = vmax.xlane.f32.xlu0 %v1436_v48 }
 0x285   :  { %1461 = vmax.xlane.f32.xlu1 %v1460_v46  ;;  %1443 = vmax.xlane.f32.xlu0 %v1442_v28 }
 0x289   :  { %1467 = vmax.xlane.f32.xlu1 %v3724_v12  ;;  %1446 = vmax.xlane.f32.xlu0 %v3727_v60 }
 0x28d   :  { %1473 = vmax.xlane.f32.xlu1 %v3745_v49  ;;  %1470 = vmax.xlane.f32.xlu0 %v3731_v1  ;;  %v2709_v49 = vld [vmem:[%s4185_s5 + $0x18] sm:$0xff]  }
 0x28e   :  { %2662 = vmatpush3.bf16.msra.mxu0 %v2709_v49 }
 0x28f   :  { %2663 = vmatprep.subr.bf16.mxu0 %v4203_v4 }
 0x291   :  { %1500 = vmax.xlane.f32.xlu1 %v3760_v36  ;;  %1476 = vmax.xlane.f32.xlu0 %v3766_v2  ;;  %v2710_v2 = vld [vmem:[%s4185_s5 + $0x10] sm:$0xff]  }
 0x292   :  { %2664 = vmatpush3.bf16.msra.mxu0 %v2710_v2 }
 0x293   :  { %2665 = vmatprep.subr.bf16.mxu0 %v4203_v4 }
 0x295   :  { %1506 = vmax.xlane.f32.xlu1 %v3769_v27  ;;  %1482 = vmax.xlane.f32.xlu0 %v3772_v53 }
 0x299   :  { %1512 = vmax.xlane.f32.xlu1 %v3776_v17  ;;  %1488 = vmax.xlane.f32.xlu0 %v3779_v7  ;;  %v2711_v17 = vld [vmem:[%s4185_s5 + $0x8] sm:$0xff]  }
 0x29a   :  { %2666 = vmatpush3.bf16.msra.mxu0 %v2711_v17 }
 0x29b   :  { %2667 = vmatprep.subr.bf16.mxu0 %v4203_v4 }
 0x29d   :  { %1497 = vmax.xlane.f32.xlu1 %v3786_v54  ;;  %1479 = vmax.xlane.f32.xlu0 %v3792_v61  ;;  %v2712_v61 = vld [vmem:[%s4185_s5] sm:$0xff]  }
 0x29e   :  { %2668 = vmatpush3.bf16.msra.mxu0 %v2712_v61 }
 0x2a1   :  { %1503 = vmax.xlane.f32.xlu1 %v3783_v35  ;;  %1485 = vmax.xlane.f32.xlu0 %v3803_v40 }
 0x2a5   :  { %1509 = vmax.xlane.f32.xlu1 %v3806_v16  ;;  %1491 = vmax.xlane.f32.xlu0 %v3809_v58 }
 0x2a9   :  { %1515 = vmax.xlane.f32.xlu1 %v3814_v25  ;;  %1494 = vmax.xlane.f32.xlu0 %v3796_v26 }
 0x2ad   :  { %1521 = vmax.xlane.f32.xlu1 %v3830_v32  ;;  %1518 = vmax.xlane.f32.xlu0 %v3818_v50 }
 0x2b1   :  { %1548 = vmax.xlane.f32.xlu1 %v1547_v11  ;;  %1524 = vmax.xlane.f32.xlu0 %v1523_v5 }
 0x2b5   :  { %1554 = vmax.xlane.f32.xlu1 %v1553_v14  ;;  %1530 = vmax.xlane.f32.xlu0 %v1529_v39 }
 0x2b9   :  { %1560 = vmax.xlane.f32.xlu1 %v1559_v10  ;;  %1527 = vmax.xlane.f32.xlu0 %v1526_v62 }
 0x2bd   :  { %1545 = vmax.xlane.f32.xlu1 %v1544_v41  ;;  %1533 = vmax.xlane.f32.xlu0 %v1532_v18 }
 0x2c1   :  { %1551 = vmax.xlane.f32.xlu1 %v1550_v19  ;;  %1542 = vmax.xlane.f32.xlu0 %v1541_v3 }
 0x2c5   :  { %1557 = vmax.xlane.f32.xlu1 %v1556_v43  ;;  %1536 = vmax.xlane.f32.xlu0 %v1535_v23 }
 0x2c9   :  { %1563 = vmax.xlane.f32.xlu1 %v1562_v55  ;;  %1539 = vmax.xlane.f32.xlu0 %v1538_v57 }
 0x2d0   :  { %v1381_v21 = vpop.xlane.xlu0 %1380  ;;  %v1375_v31 = vpop.xlane.xlu1 %1374 }
 0x2d1   :  { %v1565_v26 = vpack.c.bf16 %v1375_v31, %v1375_v31  ;;  %v1567_v40 = vpack.c.bf16 %v1381_v21, %v1381_v21 }
 0x2d3   :  { %v1708_v20 = vunpack.c.l.b16 %v1565_v26  ;;  %v1710_v32 = vunpack.c.l.b16 %v1567_v40 }
 0x2d5   :  { %v1775_v38 = vrot.slane %v1708_v20, %v2898_v15  ;;  %v1783_v24 = vrot.slane %v1710_v32, %v2898_v15 }
 0x2d6   :  { %v1387_v12 = vpop.xlane.xlu0 %1386 }
 0x2d7   :  { %v1405_v60 = vpop.xlane.xlu1 %1404  ;;  %v1569_v5 = vpack.c.bf16 %v1387_v12, %v1387_v12 }
 0x2d8   :  { %v1575_v4 = vpack.c.bf16 %v1405_v60, %v1405_v60 }
 0x2d9   :  { %v1712_v13 = vunpack.c.l.b16 %v1569_v5 }
 0x2da   :  { %v1718_v52 = vunpack.c.l.b16 %v1575_v4 }
 0x2db   :  { %v3902_v1 = vpop.xlane.xlu0 %1392  ;;  %v1791_v28 = vrot.slane %v1712_v13, %v2898_v15 }
 0x2dc   :  { %v1571_v37 = vpack.c.bf16 %v3902_v1, %v3902_v1  ;;  %v1815_v21 = vrot.slane %v1718_v52, %v2898_v15 }
 0x2de   :  { %v1411_v36 = vpop.xlane.xlu1 %1410  ;;  %v1714_v31 = vunpack.c.l.b16 %v1571_v37 }
 0x2df   :  { %v1577_v34 = vpack.c.bf16 %v1411_v36, %v1411_v36 }
 0x2e0   :  { %v1799_v26 = vrot.slane %v1714_v31, %v2898_v15 }
 0x2e1   :  { %v1720_v23 = vunpack.c.l.b16 %v1577_v34 }
 0x2e2   :  { %v3912_v27 = vpop.xlane.xlu1 %1416  ;;  %v1378_v53 = vpop.xlane.xlu0 %1377 }
 0x2e3   :  { %v1566_v7 = vpack.c.bf16 %v1378_v53, %v1378_v53  ;;  %v1579_v59 = vpack.c.bf16 %v3912_v27, %v3912_v27  ;;  %v1823_v36 = vrot.slane %v1720_v23, %v2898_v15 }
 0x2e5   :  { %v1709_v16 = vunpack.c.l.b16 %v1566_v7  ;;  %v1722_v12 = vunpack.c.l.b16 %v1579_v59 }
 0x2e6   :  { %v1402_v35 = vpop.xlane.xlu1 %1401  ;;  %v1384_v54 = vpop.xlane.xlu0 %1383 }
 0x2e7   :  { %v1568_v58 = vpack.c.bf16 %v1384_v54, %v1384_v54  ;;  %v1779_v47 = vrot.slane %v1709_v16, %v2898_v15  ;;  %v1574_v56 = vpack.c.bf16 %v1402_v35, %v1402_v35  ;;  %v1831_v40 = vrot.slane %v1722_v12, %v2898_v15 }
 0x2e9   :  { %v1711_v42 = vunpack.c.l.b16 %v1568_v58  ;;  %v2029_v14 = vsel %vm2028_vm13, %v1779_v47, %v1775_v38  ;;  %v1717_v39 = vunpack.c.l.b16 %v1574_v56 }
 0x2ea   :  { %v1408_v25 = vpop.xlane.xlu1 %1407  ;;  %v1390_v50 = vpop.xlane.xlu0 %1389  ;;  %v2031_v0 = vsel %vm2030_vm14, %v1783_v24, %v2029_v14 }
 0x2eb   :  { %v1570_v29 = vpack.c.bf16 %v1390_v50, %v1390_v50  ;;  %v1576_v51 = vpack.c.bf16 %v1408_v25, %v1408_v25  ;;  %v1787_v10 = vrot.slane %v1711_v42, %v2898_v15  ;;  %v1811_v55 = vrot.slane %v1717_v39, %v2898_v15 }
 0x2ed   :  { %v1713_v41 = vunpack.c.l.b16 %v1570_v29  ;;  %v1719_v63 = vunpack.c.l.b16 %v1576_v51  ;;  %v2033_v44 = vsel %vm2032_vm15, %v1787_v10, %v2031_v0 }
 0x2ee   :  { %v1414_v11 = vpop.xlane.xlu1 %1413  ;;  %v1396_v9 = vpop.xlane.xlu0 %1395  ;;  %v2035_v2 = vsel %vm2034_vm0, %v1791_v28, %v2033_v44 }
 0x2ef   :  { %v1578_v19 = vpack.c.bf16 %v1414_v11, %v1414_v11  ;;  %v1572_v3 = vpack.c.bf16 %v1396_v9, %v1396_v9  ;;  %v1795_v48 = vrot.slane %v1713_v41, %v2898_v15  ;;  %v1819_v60 = vrot.slane %v1719_v63, %v2898_v15 }
 0x2f1   :  { %v1721_v45 = vunpack.c.l.b16 %v1578_v19  ;;  %v1715_v22 = vunpack.c.l.b16 %v1572_v3  ;;  %v2037_v7 = vsel %vm2036_vm1, %v1795_v48, %v2035_v2 }
 0x2f2   :  { %v1420_v33 = vpop.xlane.xlu1 %1419  ;;  %v1399_v62 = vpop.xlane.xlu0 %1398  ;;  %v2039_v50 = vsel %vm2038_vm2, %v1799_v26, %v2037_v7 }
 0x2f3   :  { %v1573_v18 = vpack.c.bf16 %v1399_v62, %v1399_v62  ;;  %v1580_v30 = vpack.c.bf16 %v1420_v33, %v1420_v33  ;;  %v1827_v35 = vrot.slane %v1721_v45, %v2898_v15  ;;  %v1803_v54 = vrot.slane %v1715_v22, %v2898_v15 }
 0x2f5   :  { %v1716_v43 = vunpack.c.l.b16 %v1573_v18  ;;  %v1723_v1 = vunpack.c.l.b16 %v1580_v30  ;;  %v2041_v56 = vsel %vm2040_vm3, %v1803_v54, %v2039_v50 }
 0x2f6   :  { %v1426_v57 = vpop.xlane.xlu1 %1425  ;;  %v1423_v8 = vpop.xlane.xlu0 %1422 }
 0x2f7   :  { %v1807_v46 = vrot.slane %v1716_v43, %v2898_v15  ;;  %v1835_v58 = vrot.slane %v1723_v1, %v2898_v15  ;;  %v1582_v38 = vpack.c.bf16 %v1426_v57, %v1426_v57  ;;  %v1581_v5 = vpack.c.bf16 %v1423_v8, %v1423_v8 }
 0x2f9   :  { %v2042_v49 = vsel %vm2028_vm13, %v1811_v55, %v1807_v46  ;;  %v1725_v34 = vunpack.c.l.b16 %v1582_v38  ;;  %v1724_v14 = vunpack.c.l.b16 %v1581_v5 }
 0x2fa   :  { %v2043_v27 = vsel %vm2030_vm14, %v1815_v21, %v2042_v49  ;;  %v1453_v53 = vpop.xlane.xlu1 %1452  ;;  %v1429_v17 = vpop.xlane.xlu0 %1428 }
 0x2fb   :  { %v2044_v61 = vsel %vm2032_vm15, %v1819_v60, %v2043_v27  ;;  %v1583_v51 = vpack.c.bf16 %v1429_v17, %v1429_v17  ;;  %v1843_v41 = vrot.slane %v1725_v34, %v2898_v15  ;;  %v1839_v19 = vrot.slane %v1724_v14, %v2898_v15 }
 0x2fc   :  { %v2045_v16 = vsel %vm2034_vm0, %v1823_v36, %v2044_v61  ;;  %v1591_v59 = vpack.c.bf16 %v1453_v53, %v1453_v53 }
 0x2fd   :  { %v2046_v25 = vsel %vm2036_vm1, %v1827_v35, %v2045_v16  ;;  %v1726_v62 = vunpack.c.l.b16 %v1583_v51  ;;  %v2049_v43 = vsel %vm2028_vm13, %v1843_v41, %v1839_v19 }
 0x2fe   :  { %v1459_v20 = vpop.xlane.xlu1 %1458  ;;  %v1435_v32 = vpop.xlane.xlu0 %1434  ;;  %v2047_v47 = vsel %vm2038_vm2, %v1831_v40, %v2046_v25  ;;  %v1734_v28 = vunpack.c.l.b16 %v1591_v59 }
 0x2ff   :  { %v2048_v42 = vsel %vm2040_vm3, %v1835_v58, %v2047_v47  ;;  %v1585_v0 = vpack.c.bf16 %v1435_v32, %v1435_v32  ;;  %v1847_v63 = vrot.slane %v1726_v62, %v2898_v15  ;;  %v1593_v23 = vpack.c.bf16 %v1459_v20, %v1459_v20 }
 0x300   :  { %v2091_v11 = vpack.c.b16 %v2048_v42, %v2041_v56  ;;  %v1879_v40 = vrot.slane %v1734_v28, %v2898_v15 }
 0x301   :  { %v1728_v21 = vunpack.c.l.b16 %v1585_v0  ;;  %v2050_v60 = vsel %vm2030_vm14, %v1847_v63, %v2049_v43  ;;  %v1736_v2 = vunpack.c.l.b16 %v1593_v23 }
 0x302   :  { %v1465_v9 = vpop.xlane.xlu1 %1464  ;;  %2099 = vxpose.xlu0.c.b16.start [1/4] (short) (narrow) %v2091_v11, 16  ;;  %v1441_v29 = vpop.xlane.xlu0 %1440 }
 0x303   :  { %v1595_v31 = vpack.c.bf16 %v1465_v9, %v1465_v9  ;;  %v1587_v12 = vpack.c.bf16 %v1441_v29, %v1441_v29  ;;  %v1855_v16 = vrot.slane %v1728_v21, %v2898_v15  ;;  %v1887_v47 = vrot.slane %v1736_v2, %v2898_v15 }
 0x305   :  { %v1738_v58 = vunpack.c.l.b16 %v1595_v31  ;;  %v1730_v25 = vunpack.c.l.b16 %v1587_v12 }
 0x306   :  { %v1450_v4 = vpop.xlane.xlu1 %1449  ;;  %v1432_v24 = vpop.xlane.xlu0 %1431 }
 0x307   :  { %v1584_v39 = vpack.c.bf16 %v1432_v24, %v1432_v24  ;;  %v1590_v3 = vpack.c.bf16 %v1450_v4, %v1450_v4  ;;  %v1895_v24 = vrot.slane %v1738_v58, %v2898_v15  ;;  %v1863_v51 = vrot.slane %v1730_v25, %v2898_v15 }
 0x309   :  { %v1727_v18 = vunpack.c.l.b16 %v1584_v39  ;;  %v1733_v55 = vunpack.c.l.b16 %v1590_v3 }
 0x30a   :  { %v1456_v10 = vpop.xlane.xlu1 %1455  ;;  %v1438_v33 = vpop.xlane.xlu0 %1437 }
 0x30b   :  { %v1586_v37 = vpack.c.bf16 %v1438_v33, %v1438_v33  ;;  %v1592_v30 = vpack.c.bf16 %v1456_v10, %v1456_v10  ;;  %v1851_v44 = vrot.slane %v1727_v18, %v2898_v15  ;;  %v1875_v27 = vrot.slane %v1733_v55, %v2898_v15 }
 0x30d   :  { %v1729_v48 = vunpack.c.l.b16 %v1586_v37  ;;  %v1735_v1 = vunpack.c.l.b16 %v1592_v30  ;;  %v2051_v53 = vsel %vm2032_vm15, %v1851_v44, %v2050_v60 }
 0x30e   :  { %v1462_v13 = vpop.xlane.xlu1 %1461  ;;  %v1444_v52 = vpop.xlane.xlu0 %1443  ;;  %v2052_v56 = vsel %vm2034_vm0, %v1855_v16, %v2051_v53 }
 0x30f   :  { %v1594_v45 = vpack.c.bf16 %v1462_v13, %v1462_v13  ;;  %v1588_v22 = vpack.c.bf16 %v1444_v52, %v1444_v52  ;;  %v1859_v35 = vrot.slane %v1729_v48, %v2898_v15  ;;  %v1883_v50 = vrot.slane %v1735_v1, %v2898_v15 }
 0x311   :  { %v1737_v54 = vunpack.c.l.b16 %v1594_v45  ;;  %v1731_v61 = vunpack.c.l.b16 %v1588_v22  ;;  %v2053_v29 = vsel %vm2036_vm1, %v1859_v35, %v2052_v56 }
 0x312   :  { %v1468_v57 = vpop.xlane.xlu1 %1467  ;;  %v1447_v8 = vpop.xlane.xlu0 %1446  ;;  %v2054_v10 = vsel %vm2038_vm2, %v1863_v51, %v2053_v29 }
 0x313   :  { %v1589_v46 = vpack.c.bf16 %v1447_v8, %v1447_v8  ;;  %v1596_v49 = vpack.c.bf16 %v1468_v57, %v1468_v57  ;;  %v1891_v38 = vrot.slane %v1737_v54, %v2898_v15  ;;  %v1867_v5 = vrot.slane %v1731_v61, %v2898_v15 }
 0x315   :  { %v1732_v36 = vunpack.c.l.b16 %v1589_v46  ;;  %v1739_v20 = vunpack.c.l.b16 %v1596_v49  ;;  %v2055_v19 = vsel %vm2040_vm3, %v1867_v5, %v2054_v10 }
 0x316   :  { %v1474_v17 = vpop.xlane.xlu1 %1473  ;;  %v1471_v7 = vpop.xlane.xlu0 %1470 }
 0x317   :  { %v1871_v26 = vrot.slane %v1732_v36, %v2898_v15  ;;  %v1899_v14 = vrot.slane %v1739_v20, %v2898_v15  ;;  %v1598_v37 = vpack.c.bf16 %v1474_v17, %v1474_v17  ;;  %v1597_v59 = vpack.c.bf16 %v1471_v7, %v1471_v7  ;;  %v2715_v20 = vld [vmem:[%s4189_s9 + $0x74] ss:$8 sps:$4 sm:$0xff]  }
 0x318   :  { %2309 = vmatprep.subr.bf16.mxu1 %v2715_v20 }
 0x319   :  { %v2056_v32 = vsel %vm2028_vm13, %v1875_v27, %v1871_v26  ;;  %v1741_v43 = vunpack.c.l.b16 %v1598_v37  ;;  %v1740_v23 = vunpack.c.l.b16 %v1597_v59 }
 0x31a   :  { %v2057_v42 = vsel %vm2030_vm14, %v1879_v40, %v2056_v32  ;;  %v1501_v11 = vpop.xlane.xlu1 %1500  ;;  %v1477_v9 = vpop.xlane.xlu0 %1476 }
 0x31b   :  { %v2058_v4 = vsel %vm2032_vm15, %v1883_v50, %v2057_v42  ;;  %v1599_v30 = vpack.c.bf16 %v1477_v9, %v1477_v9  ;;  %v1907_v48 = vrot.slane %v1741_v43, %v2898_v15  ;;  %v1903_v45 = vrot.slane %v1740_v23, %v2898_v15  ;;  %v2713_v50 = vld [vmem:[%s4189_s9 + $0x70] ss:$8 sps:$4 sm:$0xff]  }
 0x31c   :  { %v2059_v34 = vsel %vm2034_vm0, %v1887_v47, %v2058_v4  ;;  %v1607_v12 = vpack.c.bf16 %v1501_v11, %v1501_v11  ;;  %v2718_v11 = vld [vmem:[%s4189_s9 + $0x64] ss:$8 sps:$4 sm:$0xff]   ;;  %2310 = vmatpush1.bf16.msra.mxu1 %v2713_v50 }
 0x31d   :  { %v2060_v39 = vsel %vm2036_vm1, %v1891_v38, %v2059_v34  ;;  %v1742_v8 = vunpack.c.l.b16 %v1599_v30  ;;  %v2063_v36 = vsel %vm2028_vm13, %v1907_v48, %v1903_v45  ;;  %2311 = vmatprep.subr.bf16.mxu1 %v2718_v11  ;;  %v2724_v45 = vld [vmem:[%s4189_s9 + $0x44] ss:$8 sps:$4 sm:$0xff]  }
 0x31e   :  { %v1507_v33 = vpop.xlane.xlu1 %1506  ;;  %v1483_v62 = vpop.xlane.xlu0 %1482  ;;  %v2061_v41 = vsel %vm2038_vm2, %v1895_v24, %v2060_v39  ;;  %v1750_v40 = vunpack.c.l.b16 %v1607_v12  ;;  %v2716_v39 = vld [vmem:[%s4189_s9 + $0x60] ss:$8 sps:$4 sm:$0xff]  }
 0x31f   :  { %v2062_v3 = vsel %vm2040_vm3, %v1899_v14, %v2061_v41  ;;  %v1601_v60 = vpack.c.bf16 %v1483_v62, %v1483_v62  ;;  %v1911_v1 = vrot.slane %v1742_v8, %v2898_v15  ;;  %v1609_v2 = vpack.c.bf16 %v1507_v33, %v1507_v33 }
 0x320   :  { %v2092_v18 = vpack.c.b16 %v2062_v3, %v2055_v19  ;;  %v1943_v10 = vrot.slane %v1750_v40, %v2898_v15  ;;  %v2721_v19 = vld [vmem:[%s4189_s9 + $0x54] ss:$8 sps:$4 sm:$0xff]   ;;  %2312 = vmatpush1.bf16.msra.mxu1 %v2716_v39 }
 0x321   :  { %v1744_v16 = vunpack.c.l.b16 %v1601_v60  ;;  %v2064_v32 = vsel %vm2030_vm14, %v1911_v1, %v2063_v36  ;;  %v1752_v9 = vunpack.c.l.b16 %v1609_v2  ;;  %2313 = vmatprep.subr.bf16.mxu1 %v2721_v19  ;;  %v2727_v2 = vld [vmem:[%s4189_s9 + $0x34] ss:$8 sps:$4 sm:$0xff]  }
 0x322   :  { %v1513_v13 = vpop.xlane.xlu1 %1512  ;;  %2100 = vxpose.xlu0.c.b16.cont [2/4] (short) (narrow) %v2092_v18, 16  ;;  %v1489_v52 = vpop.xlane.xlu0 %1488 }
 0x323   :  { %v1611_v58 = vpack.c.bf16 %v1513_v13, %v1513_v13  ;;  %v1603_v25 = vpack.c.bf16 %v1489_v52, %v1489_v52  ;;  %v1919_v33 = vrot.slane %v1744_v16, %v2898_v15  ;;  %v1951_v52 = vrot.slane %v1752_v9, %v2898_v15 }
 0x325   :  { %v1754_v62 = vunpack.c.l.b16 %v1611_v58  ;;  %v1746_v41 = vunpack.c.l.b16 %v1603_v25  ;;  %v2728_v58 = vld [vmem:[%s4189_s9 + $0x20] ss:$8 sps:$4 sm:$0xff]  }
 0x326   :  { %v1498_v0 = vpop.xlane.xlu1 %1497  ;;  %v1480_v63 = vpop.xlane.xlu0 %1479 }
 0x327   :  { %v1600_v55 = vpack.c.bf16 %v1480_v63, %v1480_v63  ;;  %v1606_v22 = vpack.c.bf16 %v1498_v0, %v1498_v0  ;;  %v1927_v8 = vrot.slane %v1746_v41, %v2898_v15 }
 0x329   :  { %v1743_v46 = vunpack.c.l.b16 %v1600_v55  ;;  %v1749_v27 = vunpack.c.l.b16 %v1606_v22 }
 0x32a   :  { %v1504_v44 = vpop.xlane.xlu1 %1503  ;;  %v1486_v57 = vpop.xlane.xlu0 %1485 }
 0x32b   :  { %v1602_v31 = vpack.c.bf16 %v1486_v57, %v1486_v57  ;;  %v1608_v49 = vpack.c.bf16 %v1504_v44, %v1504_v44  ;;  %v1915_v53 = vrot.slane %v1743_v46, %v2898_v15  ;;  %v1939_v29 = vrot.slane %v1749_v27, %v2898_v15  ;;  %v2719_v44 = vld [vmem:[%s4189_s9 + $0x50] ss:$8 sps:$4 sm:$0xff]  }
 0x32c   :  { %v1959_v57 = vrot.slane %v1754_v62, %v2898_v15  ;;  %2314 = vmatpush1.bf16.msra.mxu1 %v2719_v44 }
 0x32d   :  { %v1745_v35 = vunpack.c.l.b16 %v1602_v31  ;;  %v1751_v47 = vunpack.c.l.b16 %v1608_v49  ;;  %v2065_v38 = vsel %vm2032_vm15, %v1915_v53, %v2064_v32  ;;  %v2722_v49 = vld [vmem:[%s4189_s9 + $0x40] ss:$8 sps:$4 sm:$0xff]   ;;  %2315 = vmatprep.subr.bf16.mxu1 %v2724_v45 }
 0x32e   :  { %v1510_v28 = vpop.xlane.xlu1 %1509  ;;  %v1492_v21 = vpop.xlane.xlu0 %1491  ;;  %v2066_v37 = vsel %vm2034_vm0, %v1919_v33, %v2065_v38 }
 0x32f   :  { %v1610_v54 = vpack.c.bf16 %v1510_v28, %v1510_v28  ;;  %v1604_v61 = vpack.c.bf16 %v1492_v21, %v1492_v21  ;;  %v1923_v24 = vrot.slane %v1745_v35, %v2898_v15  ;;  %v1947_v3 = vrot.slane %v1751_v47, %v2898_v15 }
 0x330   :  { %2316 = vmatpush1.bf16.msra.mxu1 %v2722_v49 }
 0x331   :  { %v1753_v51 = vunpack.c.l.b16 %v1610_v54  ;;  %v1747_v34 = vunpack.c.l.b16 %v1604_v61  ;;  %v2067_v30 = vsel %vm2036_vm1, %v1923_v24, %v2066_v37  ;;  %2317 = vmatprep.subr.bf16.mxu1 %v2727_v2 }
 0x332   :  { %v1516_v17 = vpop.xlane.xlu1 %1515  ;;  %v1495_v7 = vpop.xlane.xlu0 %1494  ;;  %v2068_v28 = vsel %vm2038_vm2, %v1927_v8, %v2067_v30 }
 0x333   :  { %v1605_v26 = vpack.c.bf16 %v1495_v7, %v1495_v7  ;;  %v1612_v56 = vpack.c.bf16 %v1516_v17, %v1516_v17  ;;  %v1955_v43 = vrot.slane %v1753_v51, %v2898_v15  ;;  %v1931_v23 = vrot.slane %v1747_v34, %v2898_v15  ;;  %v2725_v17 = vld [vmem:[%s4189_s9 + $0x30] ss:$8 sps:$4 sm:$0xff]   ;;  %v2730_v7 = vld [vmem:[%s4189_s9 + $0x24] ss:$8 sps:$4 sm:$0xff]  }
 0x334   :  { %2318 = vmatpush1.bf16.msra.mxu1 %v2725_v17 }
 0x335   :  { %v1748_v42 = vunpack.c.l.b16 %v1605_v26  ;;  %v1755_v18 = vunpack.c.l.b16 %v1612_v56  ;;  %v2069_v60 = vsel %vm2040_vm3, %v1931_v23, %v2068_v28  ;;  %2319 = vmatprep.subr.bf16.mxu1 %v2730_v7 }
 0x336   :  { %v4003_v5 = vpop.xlane.xlu1 %1521  ;;  %v4005_v4 = vpop.xlane.xlu0 %1518 }
 0x337   :  { %v1935_v14 = vrot.slane %v1748_v42, %v2898_v15  ;;  %v1963_v22 = vrot.slane %v1755_v18, %v2898_v15  ;;  %v1614_v35 = vpack.c.bf16 %v4003_v5, %v4003_v5  ;;  %v1613_v54 = vpack.c.bf16 %v4005_v4, %v4005_v4 }
 0x338   :  { %2320 = vmatpush1.bf16.msra.mxu1 %v2728_v58 }
 0x339   :  { %v2070_v13 = vsel %vm2028_vm13, %v1939_v29, %v1935_v14  ;;  %v1757_v20 = vunpack.c.l.b16 %v1614_v35  ;;  %v1756_v32 = vunpack.c.l.b16 %v1613_v54 }
 0x33a   :  { %v2071_v59 = vsel %vm2030_vm14, %v1943_v10, %v2070_v13  ;;  %v1549_v0 = vpop.xlane.xlu1 %1548  ;;  %v1525_v63 = vpop.xlane.xlu0 %1524 }
 0x33b   :  { %v2072_v55 = vsel %vm2032_vm15, %v1947_v3, %v2071_v59  ;;  %v1615_v61 = vpack.c.bf16 %v1525_v63, %v1525_v63  ;;  %v1623_v25 = vpack.c.bf16 %v1549_v0, %v1549_v0  ;;  %v1971_v34 = vrot.slane %v1757_v20, %v2898_v15 }
 0x33c   :  { %v2073_v48 = vsel %vm2034_vm0, %v1951_v52, %v2072_v55  ;;  %v1967_v10 = vrot.slane %v1756_v32, %v2898_v15 }
 0x33d   :  { %v2074_v46 = vsel %vm2036_vm1, %v1955_v43, %v2073_v48  ;;  %v1758_v47 = vunpack.c.l.b16 %v1615_v61  ;;  %v1766_v5 = vunpack.c.l.b16 %v1623_v25 }
 0x33e   :  { %v1555_v21 = vpop.xlane.xlu1 %1554  ;;  %v1531_v31 = vpop.xlane.xlu0 %1530  ;;  %v2075_v12 = vsel %vm2038_vm2, %v1959_v57, %v2074_v46  ;;  %v2077_v57 = vsel %vm2028_vm13, %v1971_v34, %v1967_v10  ;;  %v2745_v34 = vld [vmem:[%s4193_s13 + $0x58] sm:$0xff]  }
 0x33f   :  { %v2076_v1 = vsel %vm2040_vm3, %v1963_v22, %v2075_v12  ;;  %v1625_v56 = vpack.c.bf16 %v1555_v21, %v1555_v21  ;;  %v1617_v4 = vpack.c.bf16 %v1531_v31, %v1531_v31  ;;  %v1975_v33 = vrot.slane %v1758_v47, %v2898_v15  ;;  %v2731_v47 = vld [vmem:[%s4189_s9 + $0x10] ss:$8 sps:$4 sm:$0xff]  }
 0x340   :  { %v2093_v36 = vpack.c.b16 %v2076_v1, %v2069_v60  ;;  %v2007_v59 = vrot.slane %v1766_v5, %v2898_v15  ;;  %v2741_v5 = vld [vmem:[%s4193_s13 + $0x68] sm:$0xff]  }
 0x341   :  { %v1768_v62 = vunpack.c.l.b16 %v1625_v56  ;;  %v1760_v0 = vunpack.c.l.b16 %v1617_v4  ;;  %v2078_v28 = vsel %vm2030_vm14, %v1975_v33, %v2077_v57  ;;  %v2733_v56 = vld [vmem:[%s4189_s9 + $0x14] ss:$8 sps:$4 sm:$0xff]   ;;  %v2742_v4 = vld [vmem:[%s4193_s13 + $0x28] sm:$0xff]   ;;  %v2599_v33 = vld [vmem:[%s4187_s7] ss:$0 sm:$0xff] }
 0x342   :  { %v1561_v27 = vpop.xlane.xlu1 %1560  ;;  %2101 = vxpose.xlu0.c.b16.cont [3/4] (short) (narrow) %v2093_v36, 16  ;;  %v1528_v53 = vpop.xlane.xlu0 %1527  ;;  %2321 = vmatprep.subr.bf16.mxu1 %v2733_v56  ;;  %v2350_v57 = vld [vmem:[%s4191_s11] sm:$0x3] }
 0x343   :  { %v1616_v50 = vpack.c.bf16 %v1528_v53, %v1528_v53  ;;  %v1627_v41 = vpack.c.bf16 %v1561_v27, %v1561_v27  ;;  %v2015_v8 = vrot.slane %v1768_v62, %v2898_v15  ;;  %v1983_v2 = vrot.slane %v1760_v0, %v2898_v15  ;;  %2322 = vmatpush1.bf16.msra.mxu1 %v2731_v47  ;;  %v2747_v0 = vld [vmem:[%s4193_s13 + $0x50] sm:$0xff]  }
 0x345   :  { %v1759_v24 = vunpack.c.l.b16 %v1616_v50  ;;  %v1770_v48 = vunpack.c.l.b16 %v1627_v41  ;;  %v2600_v41 = vld [vmem:[%s4188_s8] ss:$0 sm:$0xff] }
 0x346   :  { %v1546_v26 = vpop.xlane.xlu1 %1545  ;;  %v1534_v40 = vpop.xlane.xlu0 %1533 }
 0x347   :  { %v1622_v16 = vpack.c.bf16 %v1546_v26, %v1546_v26  ;;  %v1618_v51 = vpack.c.bf16 %v1534_v40, %v1534_v40  ;;  %v1979_v63 = vrot.slane %v1759_v24, %v2898_v15  ;;  %v2023_v7 = vrot.slane %v1770_v48, %v2898_v15  ;;  %v2743_v24 = vld [vmem:[%s4193_s13 + $0x60] sm:$0xff]  }
 0x348   :  { %v2364_v48 = vld [vmem:[%s4192_s12] sm:$0x3]  ;;  %s2784_s12 = smov [#allocation2]  }
 0x349   :  { %v1765_v9 = vunpack.c.l.b16 %v1622_v16  ;;  %v1761_v30 = vunpack.c.l.b16 %v1618_v51  ;;  %v2079_v60 = vsel %vm2032_vm15, %v1979_v63, %v2078_v28  ;;  %v2744_v51 = vld [vmem:[%s4193_s13 + $0x20] sm:$0xff]   ;;  %v2748_v63 = vld [vmem:[%s4193_s13 + $0x10] sm:$0xff]  }
 0x34a   :  { %v1552_v42 = vpop.xlane.xlu1 %1551  ;;  %v1543_v11 = vpop.xlane.xlu0 %1542  ;;  %v2080_v54 = vsel %vm2034_vm0, %v1983_v2, %v2079_v60 }
 0x34b   :  { %v1624_v29 = vpack.c.bf16 %v1552_v42, %v1552_v42  ;;  %v1621_v38 = vpack.c.bf16 %v1543_v11, %v1543_v11  ;;  %v2003_v18 = vrot.slane %v1765_v9, %v2898_v15  ;;  %v1987_v1 = vrot.slane %v1761_v30, %v2898_v15  ;;  %v2737_v42 = vld [vmem:[%s4193_s13 + $0x78] sm:$0xff]   ;;  %v2739_v9 = vld [vmem:[%s4193_s13 + $0x70] sm:$0xff]   ;;  %v2749_v30 = vld [vmem:[%s4193_s13 + $0x48] sm:$0xff]  }
 0x34c   :  { %v2738_v11 = vld [vmem:[%s4193_s13 + $0x38] sm:$0xff]   ;;  %2639 = vmatprep.subr.bf16.mxu0 %v2737_v42 }
 0x34d   :  { %v1767_v14 = vunpack.c.l.b16 %v1624_v29  ;;  %v1764_v39 = vunpack.c.l.b16 %v1621_v38  ;;  %v2081_v26 = vsel %vm2036_vm1, %v1987_v1, %v2080_v54  ;;  %v2734_v29 = vld [vmem:[%s4189_s9] ss:$8 sps:$4 sm:$0xff]   ;;  %v2740_v38 = vld [vmem:[%s4193_s13 + $0x30] sm:$0xff]  }
 0x34e   :  { %v1558_v19 = vpop.xlane.xlu1 %1557  ;;  %v1537_v3 = vpop.xlane.xlu0 %1536 }
 0x34f   :  { %v1999_v13 = vrot.slane %v1764_v39, %v2898_v15  ;;  %v1626_v52 = vpack.c.bf16 %v1558_v19, %v1558_v19  ;;  %v1619_v37 = vpack.c.bf16 %v1537_v3, %v1537_v3  ;;  %v2011_v43 = vrot.slane %v1767_v14, %v2898_v15  ;;  %v2746_v14 = vld [vmem:[%s4193_s13 + $0x18] sm:$0xff]   ;;  %v2593_v39 = vld [vmem:[%s4186_s6] ss:$0 sm:$0xff] }
 0x351   :  { %v2084_v23 = vsel %vm2028_vm13, %v2003_v18, %v1999_v13  ;;  %v1769_v55 = vunpack.c.l.b16 %v1626_v52  ;;  %v1762_v44 = vunpack.c.l.b16 %v1619_v37 }
 0x352   :  { %v2085_v45 = vsel %vm2030_vm14, %v2007_v59, %v2084_v23  ;;  %v1564_v22 = vpop.xlane.xlu1 %1563  ;;  %v1540_v46 = vpop.xlane.xlu0 %1539  ;;  %v2751_v23 = vld [vmem:[%s4193_s13 + $0x40] sm:$0xff]  }
 0x353   :  { %v2019_v21 = vrot.slane %v1769_v55, %v2898_v15  ;;  %v2086_v31 = vsel %vm2032_vm15, %v2011_v43, %v2085_v45  ;;  %v1628_v12 = vpack.c.bf16 %v1564_v22, %v1564_v22  ;;  %v1620_v36 = vpack.c.bf16 %v1540_v46, %v1540_v46  ;;  %v2750_v43 = vld [vmem:[%s4193_s13 + $0x8] sm:$0xff]   ;;  %v2752_v55 = vld [vmem:[%s4193_s13] sm:$0xff]   ;;  %s2565_s13 = sshll.u32 %s2784_s12, 4  ;;  %s2566_s13 = int_to_ptr.vmem [resolvable:$true] %s2565_s13 }
 0x354   :  { %v2087_v49 = vsel %vm2034_vm0, %v2015_v8, %v2086_v31  ;;  %v1991_v53 = vrot.slane %v1762_v44, %v2898_v15  ;;  %v2217_v44 = vld [vmem:[%s4190_s10] sm:$0x3]  ;;  %v2355_v45 = vrot.slane %v2350_v57, %v2877_v6  ;;  %v4205_v22 = vld [vmem:[#allocation5_spill] sm:$0xff]  ;;  %v2369_v31 = vrot.slane %v2364_v48, %v2877_v6  ;;  %s2753_s2 = scalar_lea.vmem %s2566_s13, 64  ;;  %p2758_p1 = scmp.lt.s32.totalorder %s2566_s13, %s2566_s13 }
 0x355   :  { %v2088_v27 = vsel %vm2036_vm1, %v2019_v21, %v2087_v49  ;;  %v1771_v17 = vunpack.c.l.b16 %v1628_v12  ;;  %v1763_v35 = vunpack.c.l.b16 %v1620_v36  ;;  %v2222_v8 = vrot.slane %v2217_v44, %v2877_v6  ;;  %v2617_v6 = vld [vmem:[%s4194_s14] ss:$0 sm:$0xff]  ;;  %p2754_p0 = scmp.ne.s32.totalorder %s2566_s13, %s2753_s2  ;;  %p2759_p2 = scmp.lt.s32.totalorder %s2753_s2, %s2753_s2 }
 0x356   :  { %v2089_v40 = vsel %vm2038_vm2, %v2023_v7, %v2088_v27  ;;  %v2082_v58 = vsel %vm2038_vm2, %v1991_v53, %v2081_v26  ;;  %v2226_v46 = vrot.slane %v2217_v44, %v4205_v22  ;;  %v2359_v12 = vrot.slane %v2350_v57, %v4205_v22 }
 0x357   :  { %v2027_v61 = vrot.slane %v1771_v17, %v2898_v15  ;;  %v1995_v16 = vrot.slane %v1763_v35, %v2898_v15  ;;  %v2736_v15 = vld [vmem:[%s4189_s9 + $0x4] ss:$8 sps:$4 sm:$0xff]   ;;  %v2373_v36 = vrot.slane %v2364_v48, %v4205_v22  ;;  %p2760_p3 = por %p2759_p2, %p2758_p1 }
 0x358   :  { %2323 = vmatprep.subr.bf16.mxu1 %v2736_v15 }
 0x359   :  { %v2090_v25 = vsel %vm2040_vm3, %v2027_v61, %v2089_v40  ;;  %v2083_v50 = vsel %vm2040_vm3, %v1995_v16, %v2082_v58  ;;  %2324 = vmatpush1.bf16.msra.mxu1 %v2734_v29  ;;  %p2761_p4 = pnand %p2760_p3, %p2754_p0 }
 0x35a   :  { %v2094_v20 = vpack.c.b16 %v2090_v25, %v2083_v50 }
 0x35c   :  { %2102 = vxpose.xlu0.c.b16.end [4/4] (short) (narrow) %v2094_v20, 16 }
 0x3b2   :  { %v2107_v32 = vpop.trf.xlu0 }
 0x3b3   :  { %2670 = vmatmul.mubr.msk.bf16.vlgmr.msra.gmra.mxu0 %vm2139_vm4, %v2107_v32 }
 0x3b4   :  { %2640 = vmatpush3.bf16.msra.mxu0 %v2738_v11 }
 0x3b5   :  { %2641 = vmatprep.subr.bf16.mxu0 %v2739_v9 }
 0x3b8   :  { %2642 = vmatpush3.bf16.msra.mxu0 %v2740_v38 }
 0x3b9   :  { %2643 = vmatprep.subr.bf16.mxu0 %v2741_v5 }
 0x3bc   :  { %2644 = vmatpush3.bf16.msra.mxu0 %v2742_v4 }
 0x3bd   :  { %2645 = vmatprep.subr.bf16.mxu0 %v2743_v24 }
 0x3c0   :  { %2646 = vmatpush3.bf16.msra.mxu0 %v2744_v51 }
 0x3c1   :  { %2647 = vmatprep.subr.bf16.mxu0 %v2745_v34 }
 0x3c4   :  { %2648 = vmatpush3.bf16.msra.mxu0 %v2746_v14 }
 0x3c5   :  { %2649 = vmatprep.subr.bf16.mxu0 %v2747_v0 }
 0x3c8   :  { %2650 = vmatpush3.bf16.msra.mxu0 %v2748_v63 }
 0x3c9   :  { %2651 = vmatprep.subr.bf16.mxu0 %v2749_v30 }
 0x3cc   :  { %2652 = vmatpush3.bf16.msra.mxu0 %v2750_v43 }
 0x3cd   :  { %2653 = vmatprep.subr.bf16.mxu0 %v2751_v23 }
 0x3d0   :  { %2654 = vmatpush3.bf16.msra.mxu0 %v2752_v55 }
 0x473   :  { %v2177_v10 = vpop.f32.mrf.mxu0 }
 0x474   :  { %v2178_v62 = vadd.f32 %v2593_v39, %v2177_v10 }
 0x475   :  { %v2671_v19 = vpop.f32.mrf.mxu0 }
 0x476   :  { %v2190_v3 = vmul.f32 %v2599_v33, %v2178_v62 }
 0x477   :  { %v2180_v18 = vpop.f32.mrf.mxu0 }
 0x478   :  { %v2198_v13 = vadd.f32 %v2600_v41, %v2190_v3 }
 0x479   :  { %v2672_v52 = vpop.f32.mrf.mxu0 }
 0x47a   :  { %v2199_v37 = vmax.f32 %v2198_v13, 0.0 }
 0x47c   :  { %v2200_v59 = vpack.c.bf16 %v2199_v37, %v2199_v37 }
 0x47e   :  { %2342 = vmatmul.mubr.bf16.vlgmr.msra.gmra.mxu1 %v2200_v59 }
 0x53e   :  { %v2343_v28 = vpop.f32.mrf.mxu1 }
 0x53f   :  { %v2344_v21 = vadd.f32 %v2343_v28, %v2222_v8 }
 0x540   :  { %v2345_v60 = vpop.f32.mrf.mxu1 }
 0x541   :  { %v2362_v1 = vmul.f32 %v2355_v45, %v2344_v21  ;;  %v2346_v49 = vadd.f32 %v2345_v60, %v2226_v46 }
 0x542   :  { %v2347_v2 = vpop.f32.mrf.mxu1 }
 0x543   :  { %v2376_v27 = vadd.f32 %v2369_v31, %v2362_v1  ;;  %v2363_v53 = vmul.f32 %v2359_v12, %v2346_v49 }
 0x544   :  { %v2348_v17 = vpop.f32.mrf.mxu1 }
 0x545   :  { %v2377_v7 = vadd.f32 %v2373_v36, %v2363_v53  ;;  %v2378_v35 = vmax.f32 %v2376_v27, 0.0 }
 0x547   :  { %v2379_v54 = vmax.f32 %v2377_v7, 0.0  ;;  %v2380_v26 = vpack.c.bf16 %v2378_v35, %v2378_v35 }
 0x549   :  { %v2381_v61 = vpack.c.bf16 %v2379_v54, %v2379_v54 }
 0x54b   :  { %2549 = vmatprep.mubr.bf16.mxu0 %v2381_v61 }
 0x54c   :  { %2550 = vmatmul.mubr.bf16.vlgmr.msra.gmra.mxu0 %v2380_v26 }
 0x60c   :  { %v2655_v40 = vpop.f32.mrf.mxu0 }
 0x60e   :  { %v2656_v16 = vpop.f32.mrf.mxu0 }
 0x60f   :  { %v2657_v58 = vadd.f32 %v2656_v16, %v2655_v40 }
 0x610   :  { %v2658_v25 = vpop.f32.mrf.mxu0 }
 0x611   :  { %v2552_v50 = vadd.f32 %v2657_v58, %v2617_v6 }
 0x612   :  { %v2659_v20 = vpop.f32.mrf.mxu0 }
 0x613   :  { %2558 = vst.msk [vmem:[#allocation2] sm:$0xf] %vm2557_vm5, %v2552_v50 }
 0x614   :  { %2764 = shalt.err (!%p2761_p4)
}
 0x615   :  { %2568 = dma.vmem_to_hbm [thread:$0]  %s2566_s13, 64, %s4195_s15, [#allocation3]  }
 0x616   :  { %2773 = dma.done.wait [#allocation3], 64  }
 0x617   :  { %2774 = vsyncadd [#allocation3], 4294967232 }
 0x618   :  { %2572 = vsyncpa [#allocation3], 1 }

</bundles_post_ra>
